<compile_context>
chip_gen: v7x
topology: tpu7x:2x2x1
jax: 0.10.0
libtpu: 0.0.40
codegen_flags: <defaults>
</compile_context>

<pallas_src>
import math
import functools

import jax
import jax.numpy as jnp
from jax.experimental import pallas as pl
from jax.experimental.pallas import tpu as pltpu

# ---- small synthetic config (consistent with the module's __init__) ----
B = 2            # batch
S = 8            # sequence length (== Config.DATA.MAX_TEXT_LENGTH here)
H = 32           # hidden_size
NH = 4           # num_attention_heads
DH = H // NH     # attention_head_size
I = 64           # intermediate_size
EPS = 1e-12      # layer_norm_eps
MAX_LEN = S      # Config.DATA.MAX_TEXT_LENGTH

# Matmul operand dtype.  Set to jnp.bfloat16 on v6e/v7x at production sizes
# (MXU is native bf16; accumulation stays f32 via preferred_element_type).
# Kept f32 at this toy size so the correctness check against the f32
# reference stays tight.
MM_DTYPE = jnp.float32


def _mm(a, w):
    """MXU matmul with f32 accumulation (operands optionally bf16)."""
    return jnp.dot(a.astype(MM_DTYPE), w.astype(MM_DTYPE),
                   preferred_element_type=jnp.float32)


def _erf(x):
    """erf via Abramowitz & Stegun 7.1.26 (|abs err| <= 1.5e-7).

    Built only from exp / mul / add / where so the kernel never relies on an
    erf lowering rule in Mosaic."""
    a1, a2, a3, a4, a5 = (0.254829592, -0.284496736, 1.421413741,
                          -1.453152027, 1.061405429)
    p = 0.3275911
    ax = jnp.abs(x)
    t = 1.0 / (1.0 + p * ax)
    poly = ((((a5 * t + a4) * t + a3) * t + a2) * t + a1) * t
    y = 1.0 - poly * jnp.exp(-ax * ax)
    return jnp.where(x >= 0, y, -y)


def _gelu_exact(x):
    """Matches torch.nn.GELU() (erf form) to ~1e-7."""
    return 0.5 * x * (1.0 + _erf(x * (1.0 / math.sqrt(2.0))))


def transformer_layer_kernel(
    x_ref, pe_ref,
    wq_ref, bq_ref, wk_ref, bk_ref, wv_ref, bv_ref, wo_ref, bo_ref,
    w1_ref, b1_ref, w2_ref, b2_ref,
    g1_ref, be1_ref, g2_ref, be2_ref,
    out_ref, probs_ref,
):
    """One grid step processes a block of `bb` batch elements.

    All dense math (LN / Q/K/V / output projection / FFN) runs on the folded
    (bb*S, H) row block; attention keeps the head axis as a dot_general batch
    dimension (no per-head lane slices, no tiny per-head matmuls)."""
    bb = x_ref.shape[0]        # static batch block (1 on 2-TC chips, B otherwise)
    m = bb * S

    x = x_ref[...].reshape(m, H)          # fold batch into the matmul M dim
    pe_t = pe_ref[...]                    # (S, DH, S) pre-transposed rel.-pos. emb.

    # ---------------- LayerNorm 1 ----------------
    mu = jnp.mean(x, axis=-1, keepdims=True)
    var = jnp.mean((x - mu) ** 2, axis=-1, keepdims=True)
    xn = (x - mu) * jax.lax.rsqrt(var + EPS) * g1_ref[...] + be1_ref[...]

    # ---------------- Q/K/V projections: three (m,H)@(H,H) MXU matmuls ----------------
    q = _mm(xn, wq_ref[...]) + bq_ref[...]
    k = _mm(xn, wk_ref[...]) + bk_ref[...]
    v = _mm(xn, wv_ref[...]) + bv_ref[...]

    # head split once for the whole block: (m, H) -> (m, NH, DH) -> (NH, m, DH)
    q3 = q.reshape(m, NH, DH)                       # (b·l, h, d) — used for rel scores
    qh_all = jnp.transpose(q3, (1, 0, 2))           # (h, b·l, d)
    kh_all = jnp.transpose(k.reshape(m, NH, DH), (1, 0, 2))
    vh_all = jnp.transpose(v.reshape(m, NH, DH), (1, 0, 2))

    inv_scale = 1.0 / math.sqrt(DH)

    # ---------------- attention: all heads batched on the MXU ----------------
    ctx_parts = []
    for b in range(bb):                             # static unroll, bb <= B = 2
        rows = slice(b * S, (b + 1) * S)
        qh = qh_all[:, rows, :]                     # (h, l, d)
        kh = kh_all[:, rows, :]
        vh = vh_all[:, rows, :]

        # content scores: one head-batched contraction
        scores = jnp.einsum('hld,hrd->hlr', qh, kh,
                            preferred_element_type=jnp.float32)       # (h, l, r)
        # relative-position scores, also on the MXU (batched over the query index)
        rel = jnp.einsum('lhd,ldr->lhr', q3[rows], pe_t,
                         preferred_element_type=jnp.float32)          # (l, h, r)
        scores = (scores + jnp.transpose(rel, (1, 0, 2))) * inv_scale
        # TODO(synk): attention_mask input not wired in (None in this synthetic run)

        # softmax: one row-sum, one small reciprocal, one broadcast multiply.
        # (approx=True is the production option; exact here keeps probs f32-tight.)
        scores = scores - jnp.max(scores, axis=-1, keepdims=True)
        e = jnp.exp(scores)
        p = e * pl.reciprocal(jnp.sum(e, axis=-1, keepdims=True))

        # lane-dense probs store: last stored dim is S*S = 64 instead of 8
        probs_ref[b] = p.reshape(NH, S * S)

        ctx_parts.append(jnp.einsum('hlr,hrd->hld',
                                    p.astype(MM_DTYPE), vh.astype(MM_DTYPE),
                                    preferred_element_type=jnp.float32))  # (h, l, d)

    # concatenate contexts and run ONE output-projection matmul
    ctx_all = jnp.concatenate(ctx_parts, axis=1)                      # (h, b·l, d)
    ctx_flat = jnp.transpose(ctx_all, (1, 0, 2)).reshape(m, H)        # (b·l, h·d)
    attn_out = _mm(ctx_flat, wo_ref[...]) + bo_ref[...]

    # residual 1 (dropout == identity at inference)
    h1 = x + attn_out

    # ---------------- LayerNorm 2 ----------------
    mu2 = jnp.mean(h1, axis=-1, keepdims=True)
    var2 = jnp.mean((h1 - mu2) ** 2, axis=-1, keepdims=True)
    hn = (h1 - mu2) * jax.lax.rsqrt(var2 + EPS) * g2_ref[...] + be2_ref[...]

    # ---------------- FFN: Linear -> GELU(exact erf) -> Linear ----------------
    ff = _mm(hn, w1_ref[...]) + b1_ref[...]
    ff = _gelu_exact(ff)                              # matches torch nn.GELU() (erf)
    ff = _mm(ff, w2_ref[...]) + b2_ref[...]

    # residual 2
    out_ref[...] = (h1 + ff).reshape(bb, S, H)


def _rep_spec(shape):
    """Full-array block, replicated (constant index) across the batch grid axis."""
    zeros = (0,) * len(shape)
    return pl.BlockSpec(shape, lambda g, _z=zeros: _z)


@functools.partial(jax.jit, static_argnames=("batch_block",))
def transformer_layer(x, params, *, batch_block=B):
    """x: (B, S, H) f32 -> (layer_output (B,S,H), attention_probs (B,NH,S,S))."""
    bb = batch_block
    assert B % bb == 0
    grid = (B // bb,)

    # relative-position embedding gather + transpose: free XLA-side layout plumbing
    pos = jnp.arange(S)
    distance = pos[:, None] - pos[None, :] + S - 1            # (S, S) in [0, 2S-2]
    pe_t = params["rel_enc"][distance].transpose(0, 2, 1)     # (S, DH, S)

    args = (
        x, pe_t,
        params["wq"], params["bq"], params["wk"], params["bk"],
        params["wv"], params["bv"], params["wo"], params["bo"],
        params["w1"], params["b1"], params["w2"], params["b2"],
        params["g1"], params["be1"], params["g2"], params["be2"],
    )

    in_specs = [
        pl.BlockSpec((bb, S, H), lambda g: (g, 0, 0)),        # x
        _rep_spec((S, DH, S)),                                # pe_t
        _rep_spec((H, H)), _rep_spec((1, H)),                 # wq, bq
        _rep_spec((H, H)), _rep_spec((1, H)),                 # wk, bk
        _rep_spec((H, H)), _rep_spec((1, H)),                 # wv, bv
        _rep_spec((H, H)), _rep_spec((1, H)),                 # wo, bo
        _rep_spec((H, I)), _rep_spec((1, I)),                 # w1, b1
        _rep_spec((I, H)), _rep_spec((1, H)),                 # w2, b2
        _rep_spec((1, H)), _rep_spec((1, H)),                 # g1, be1
        _rep_spec((1, H)), _rep_spec((1, H)),                 # g2, be2
    ]
    out_specs = (
        pl.BlockSpec((bb, S, H), lambda g: (g, 0, 0)),
        pl.BlockSpec((bb, NH, S * S), lambda g: (g, 0, 0)),
    )
    out_shape = (
        jax.ShapeDtypeStruct((B, S, H), jnp.float32),
        jax.ShapeDtypeStruct((B, NH, S * S), jnp.float32),    # lane-dense probs slab
    )

    out, probs_flat = pl.pallas_call(
        transformer_layer_kernel,
        out_shape=out_shape,
        grid=grid,
        in_specs=in_specs,
        out_specs=out_specs,
        compiler_params=pltpu.CompilerParams(
            dimension_semantics=("parallel",)),
    )(*args)

    return out, probs_flat.reshape(B, NH, S, S)


def pick_batch_block() -> int:
    """v7x has 2 TensorCores/chip -> keep a parallel grid over the batch so each
    core takes one element.  v5e/v6e have a single TC -> fold the whole batch
    into one grid step (each extra sequential step is pure overhead here)."""
    try:
        kind = jax.devices()[0].device_kind.lower()
    except Exception:
        kind = ""
    return 1 if "v7" in kind else B


# ----------------------- pure-JAX reference (for checking) -----------------------
def reference(x, params):
    def ln(v, g, b):
        mu = jnp.mean(v, axis=-1, keepdims=True)
        var = jnp.mean((v - mu) ** 2, axis=-1, keepdims=True)
        return (v - mu) / jnp.sqrt(var + EPS) * g[0] + b[0]

    xn = ln(x, params["g1"], params["be1"])
    q = xn @ params["wq"] + params["bq"][0]
    k = xn @ params["wk"] + params["bk"][0]
    v = xn @ params["wv"] + params["bv"][0]

    def heads(t):  # (B,S,H) -> (B,NH,S,DH)
        return t.reshape(B, S, NH, DH).transpose(0, 2, 1, 3)

    qh, kh, vh = heads(q), heads(k), heads(v)
    scores = jnp.einsum("bhld,bhrd->bhlr", qh, kh)
    pos = jnp.arange(S)
    distance = pos[:, None] - pos[None, :] + S - 1
    pe = params["rel_enc"][distance]
    scores = scores + jnp.einsum("bhld,lrd->bhlr", qh, pe)
    scores = scores / math.sqrt(DH)
    probs = jax.nn.softmax(scores, axis=-1)
    ctx = jnp.einsum("bhlr,bhrd->bhld", probs, vh)
    ctx = ctx.transpose(0, 2, 1, 3).reshape(B, S, H)
    attn_out = ctx @ params["wo"] + params["bo"][0]
    h1 = x + attn_out
    hn = ln(h1, params["g2"], params["be2"])
    ff = jax.nn.gelu(hn @ params["w1"] + params["b1"][0], approximate=False)
    ff = ff @ params["w2"] + params["b2"][0]
    return h1 + ff, probs


def init_params(key):
    ks = jax.random.split(key, 12)

    def lin(k, fin, fout):
        kw, kb = jax.random.split(k)
        w = jax.random.normal(kw, (fin, fout), jnp.float32) * 0.02
        b = jax.random.normal(kb, (1, fout), jnp.float32) * 0.02
        return w, b

    wq, bq = lin(ks[0], H, H)
    wk, bk = lin(ks[1], H, H)
    wv, bv = lin(ks[2], H, H)
    wo, bo = lin(ks[3], H, H)
    w1, b1 = lin(ks[4], H, I)
    w2, b2 = lin(ks[5], I, H)
    rel_enc = jax.random.normal(ks[6], (2 * MAX_LEN - 1, DH), jnp.float32) * 0.02
    return dict(
        wq=wq, bq=bq, wk=wk, bk=bk, wv=wv, bv=bv, wo=wo, bo=bo,
        w1=w1, b1=b1, w2=w2, b2=b2,
        g1=jnp.ones((1, H), jnp.float32), be1=jnp.zeros((1, H), jnp.float32),
        g2=jnp.ones((1, H), jnp.float32), be2=jnp.zeros((1, H), jnp.float32),
        rel_enc=rel_enc,
    )


if __name__ == "__main__":
    key = jax.random.PRNGKey(0)
    kx, kp = jax.random.split(key)
    x = jax.random.normal(kx, (B, S, H), jnp.float32)
    params = init_params(kp)

    bb = pick_batch_block()
    out, probs = transformer_layer(x, params, batch_block=bb)
    out, probs = jax.block_until_ready((out, probs))

    ref_out, ref_probs = reference(x, params)
    # Everything accumulates in f32; only deltas are the exact-reciprocal
    # softmax normalization order and the 1.5e-7 erf polynomial.
    assert jnp.allclose(out, ref_out, atol=1e-3, rtol=1e-3), "output mismatch"
    assert jnp.allclose(probs, ref_probs, atol=1e-3, rtol=1e-3), "probs mismatch"

    print("KERNEL_OK")
</pallas_src>

<mosaic_0001>
module attributes {stable_mosaic.version = 11 : i64} {
  func.func @transformer_layer_kernel(%arg0: i32, %arg1: memref<2x8x32xf32, #tpu.memory_space<vmem>>, %arg2: memref<8x8x8xf32, #tpu.memory_space<vmem>>, %arg3: memref<32x32xf32, #tpu.memory_space<vmem>>, %arg4: memref<1x32xf32, #tpu.memory_space<vmem>>, %arg5: memref<32x32xf32, #tpu.memory_space<vmem>>, %arg6: memref<1x32xf32, #tpu.memory_space<vmem>>, %arg7: memref<32x32xf32, #tpu.memory_space<vmem>>, %arg8: memref<1x32xf32, #tpu.memory_space<vmem>>, %arg9: memref<32x32xf32, #tpu.memory_space<vmem>>, %arg10: memref<1x32xf32, #tpu.memory_space<vmem>>, %arg11: memref<32x64xf32, #tpu.memory_space<vmem>>, %arg12: memref<1x64xf32, #tpu.memory_space<vmem>>, %arg13: memref<64x32xf32, #tpu.memory_space<vmem>>, %arg14: memref<1x32xf32, #tpu.memory_space<vmem>>, %arg15: memref<1x32xf32, #tpu.memory_space<vmem>>, %arg16: memref<1x32xf32, #tpu.memory_space<vmem>>, %arg17: memref<1x32xf32, #tpu.memory_space<vmem>>, %arg18: memref<1x32xf32, #tpu.memory_space<vmem>>, %arg19: memref<2x8x32xf32, #tpu.memory_space<vmem>>, %arg20: memref<2x4x64xf32, #tpu.memory_space<vmem>>) attributes {dimension_semantics = [#tpu.dimension_semantics<parallel>], iteration_bounds = array<i64: 1>, scalar_prefetch = 0 : i64, scratch_operands = 0 : i64, tpu.core_type = #tpu.core_type<tc>, window_params = [{transform_indices = @transform_0, window_bounds = array<i64: 2, 8, 32>}, {pipeline_mode = #tpu.pipeline_mode<synchronous>, transform_indices = @transform_1, window_bounds = array<i64: 8, 8, 8>}, {pipeline_mode = #tpu.pipeline_mode<synchronous>, transform_indices = @transform_2, window_bounds = array<i64: 32, 32>}, {pipeline_mode = #tpu.pipeline_mode<synchronous>, transform_indices = @transform_3, window_bounds = array<i64: 1, 32>}, {pipeline_mode = #tpu.pipeline_mode<synchronous>, transform_indices = @transform_4, window_bounds = array<i64: 32, 32>}, {pipeline_mode = #tpu.pipeline_mode<synchronous>, transform_indices = @transform_5, window_bounds = array<i64: 1, 32>}, {pipeline_mode = #tpu.pipeline_mode<synchronous>, transform_indices = @transform_6, window_bounds = array<i64: 32, 32>}, {pipeline_mode = #tpu.pipeline_mode<synchronous>, transform_indices = @transform_7, window_bounds = array<i64: 1, 32>}, {pipeline_mode = #tpu.pipeline_mode<synchronous>, transform_indices = @transform_8, window_bounds = array<i64: 32, 32>}, {pipeline_mode = #tpu.pipeline_mode<synchronous>, transform_indices = @transform_9, window_bounds = array<i64: 1, 32>}, {pipeline_mode = #tpu.pipeline_mode<synchronous>, transform_indices = @transform_10, window_bounds = array<i64: 32, 64>}, {pipeline_mode = #tpu.pipeline_mode<synchronous>, transform_indices = @transform_11, window_bounds = array<i64: 1, 64>}, {pipeline_mode = #tpu.pipeline_mode<synchronous>, transform_indices = @transform_12, window_bounds = array<i64: 64, 32>}, {pipeline_mode = #tpu.pipeline_mode<synchronous>, transform_indices = @transform_13, window_bounds = array<i64: 1, 32>}, {pipeline_mode = #tpu.pipeline_mode<synchronous>, transform_indices = @transform_14, window_bounds = array<i64: 1, 32>}, {pipeline_mode = #tpu.pipeline_mode<synchronous>, transform_indices = @transform_15, window_bounds = array<i64: 1, 32>}, {pipeline_mode = #tpu.pipeline_mode<synchronous>, transform_indices = @transform_16, window_bounds = array<i64: 1, 32>}, {pipeline_mode = #tpu.pipeline_mode<synchronous>, transform_indices = @transform_17, window_bounds = array<i64: 1, 32>}, {transform_indices = @transform_18, window_bounds = array<i64: 2, 8, 32>}, {transform_indices = @transform_19, window_bounds = array<i64: 2, 4, 64>}]} {
    %c0 = arith.constant 0 : index
    %c0_0 = arith.constant 0 : index
    %c0_1 = arith.constant 0 : index
    %0 = vector.load %arg1[%c0, %c0_0, %c0_1] : memref<2x8x32xf32, #tpu.memory_space<vmem>>, vector<2x8x32xf32>
    %1 = vector.shape_cast %0 : vector<2x8x32xf32> to vector<16x32xf32>
    %c0_2 = arith.constant 0 : index
    %c0_3 = arith.constant 0 : index
    %c0_4 = arith.constant 0 : index
    %2 = vector.load %arg2[%c0_2, %c0_3, %c0_4] : memref<8x8x8xf32, #tpu.memory_space<vmem>>, vector<8x8x8xf32>
    %cst = arith.constant dense<0.000000e+00> : vector<16xf32>
    %3 = vector.multi_reduction <add>, %1, %cst [1] : vector<16x32xf32> to vector<16xf32>
    %4 = vector.shape_cast %3 : vector<16xf32> to vector<16x1xf32>
    %cst_5 = arith.constant 3.200000e+01 : f32
    %5 = vector.broadcast %cst_5 : f32 to vector<16x1xf32>
    %6 = arith.divf %4, %5 : vector<16x1xf32>
    %7 = vector.broadcast %6 : vector<16x1xf32> to vector<16x32xf32>
    %8 = arith.subf %1, %7 : vector<16x32xf32>
    %9 = arith.mulf %8, %8 : vector<16x32xf32>
    %cst_6 = arith.constant dense<0.000000e+00> : vector<16xf32>
    %10 = vector.multi_reduction <add>, %9, %cst_6 [1] : vector<16x32xf32> to vector<16xf32>
    %11 = vector.shape_cast %10 : vector<16xf32> to vector<16x1xf32>
    %cst_7 = arith.constant 3.200000e+01 : f32
    %12 = vector.broadcast %cst_7 : f32 to vector<16x1xf32>
    %13 = arith.divf %11, %12 : vector<16x1xf32>
    %14 = vector.broadcast %6 : vector<16x1xf32> to vector<16x32xf32>
    %15 = arith.subf %1, %14 : vector<16x32xf32>
    %cst_8 = arith.constant 9.99999996E-13 : f32
    %16 = vector.broadcast %cst_8 : f32 to vector<16x1xf32>
    %17 = arith.addf %13, %16 : vector<16x1xf32>
    %18 = math.rsqrt %17 : vector<16x1xf32>
    %19 = vector.broadcast %18 : vector<16x1xf32> to vector<16x32xf32>
    %20 = arith.mulf %15, %19 : vector<16x32xf32>
    %c0_9 = arith.constant 0 : index
    %c0_10 = arith.constant 0 : index
    %21 = vector.load %arg15[%c0_9, %c0_10] : memref<1x32xf32, #tpu.memory_space<vmem>>, vector<1x32xf32>
    %22 = vector.broadcast %21 : vector<1x32xf32> to vector<16x32xf32>
    %23 = arith.mulf %20, %22 : vector<16x32xf32>
    %c0_11 = arith.constant 0 : index
    %c0_12 = arith.constant 0 : index
    %24 = vector.load %arg16[%c0_11, %c0_12] : memref<1x32xf32, #tpu.memory_space<vmem>>, vector<1x32xf32>
    %25 = vector.broadcast %24 : vector<1x32xf32> to vector<16x32xf32>
    %26 = arith.addf %23, %25 : vector<16x32xf32>
    %c0_13 = arith.constant 0 : index
    %c0_14 = arith.constant 0 : index
    %27 = vector.load %arg3[%c0_13, %c0_14] : memref<32x32xf32, #tpu.memory_space<vmem>>, vector<32x32xf32>
    %cst_15 = arith.constant dense<0.000000e+00> : vector<16x32xf32>
    %28 = tpu.matmul %26, %27, %cst_15 {dimension_numbers = #tpu.dot_dimension_numbers<[1], [0], [0], [1], [0, 0, 1, 1], [], []>} : vector<16x32xf32>, vector<32x32xf32>, vector<16x32xf32> -> vector<16x32xf32>
    %c0_16 = arith.constant 0 : index
    %c0_17 = arith.constant 0 : index
    %29 = vector.load %arg4[%c0_16, %c0_17] : memref<1x32xf32, #tpu.memory_space<vmem>>, vector<1x32xf32>
    %30 = vector.broadcast %29 : vector<1x32xf32> to vector<16x32xf32>
    %31 = arith.addf %28, %30 : vector<16x32xf32>
    %c0_18 = arith.constant 0 : index
    %c0_19 = arith.constant 0 : index
    %32 = vector.load %arg5[%c0_18, %c0_19] : memref<32x32xf32, #tpu.memory_space<vmem>>, vector<32x32xf32>
    %cst_20 = arith.constant dense<0.000000e+00> : vector<16x32xf32>
    %33 = tpu.matmul %26, %32, %cst_20 {dimension_numbers = #tpu.dot_dimension_numbers<[1], [0], [0], [1], [0, 0, 1, 1], [], []>} : vector<16x32xf32>, vector<32x32xf32>, vector<16x32xf32> -> vector<16x32xf32>
    %c0_21 = arith.constant 0 : index
    %c0_22 = arith.constant 0 : index
    %34 = vector.load %arg6[%c0_21, %c0_22] : memref<1x32xf32, #tpu.memory_space<vmem>>, vector<1x32xf32>
    %35 = vector.broadcast %34 : vector<1x32xf32> to vector<16x32xf32>
    %36 = arith.addf %33, %35 : vector<16x32xf32>
    %c0_23 = arith.constant 0 : index
    %c0_24 = arith.constant 0 : index
    %37 = vector.load %arg7[%c0_23, %c0_24] : memref<32x32xf32, #tpu.memory_space<vmem>>, vector<32x32xf32>
    %cst_25 = arith.constant dense<0.000000e+00> : vector<16x32xf32>
    %38 = tpu.matmul %26, %37, %cst_25 {dimension_numbers = #tpu.dot_dimension_numbers<[1], [0], [0], [1], [0, 0, 1, 1], [], []>} : vector<16x32xf32>, vector<32x32xf32>, vector<16x32xf32> -> vector<16x32xf32>
    %c0_26 = arith.constant 0 : index
    %c0_27 = arith.constant 0 : index
    %39 = vector.load %arg8[%c0_26, %c0_27] : memref<1x32xf32, #tpu.memory_space<vmem>>, vector<1x32xf32>
    %40 = vector.broadcast %39 : vector<1x32xf32> to vector<16x32xf32>
    %41 = arith.addf %38, %40 : vector<16x32xf32>
    %42 = vector.shape_cast %31 : vector<16x32xf32> to vector<16x4x8xf32>
    %43 = tpu.transpose %42, [1, 0, 2] : vector<16x4x8xf32> -> vector<4x16x8xf32>
    %44 = vector.shape_cast %36 : vector<16x32xf32> to vector<16x4x8xf32>
    %45 = tpu.transpose %44, [1, 0, 2] : vector<16x4x8xf32> -> vector<4x16x8xf32>
    %46 = vector.shape_cast %41 : vector<16x32xf32> to vector<16x4x8xf32>
    %47 = tpu.transpose %46, [1, 0, 2] : vector<16x4x8xf32> -> vector<4x16x8xf32>
    %48 = vector.extract_strided_slice %43 {offsets = [0, 0, 0], sizes = [4, 8, 8], strides = [1, 1, 1]} : vector<4x16x8xf32> to vector<4x8x8xf32>
    %49 = vector.extract_strided_slice %45 {offsets = [0, 0, 0], sizes = [4, 8, 8], strides = [1, 1, 1]} : vector<4x16x8xf32> to vector<4x8x8xf32>
    %50 = vector.extract_strided_slice %47 {offsets = [0, 0, 0], sizes = [4, 8, 8], strides = [1, 1, 1]} : vector<4x16x8xf32> to vector<4x8x8xf32>
    "tpu.trace_start"() <{level = 10 : i32, message = "hld,hrd->hlr"}> : () -> ()
    %cst_28 = arith.constant dense<0.000000e+00> : vector<4x8x8xf32>
    %51 = tpu.matmul %48, %49, %cst_28 {dimension_numbers = #tpu.dot_dimension_numbers<[2], [2], [1], [1], [0, 0, 0, 1, 1, 1], [0], [0]>} : vector<4x8x8xf32>, vector<4x8x8xf32>, vector<4x8x8xf32> -> vector<4x8x8xf32>
    "tpu.trace_stop"() : () -> ()
    %52 = vector.extract_strided_slice %42 {offsets = [0, 0, 0], sizes = [8, 4, 8], strides = [1, 1, 1]} : vector<16x4x8xf32> to vector<8x4x8xf32>
    "tpu.trace_start"() <{level = 10 : i32, message = "lhd,ldr->lhr"}> : () -> ()
    %cst_29 = arith.constant dense<0.000000e+00> : vector<8x4x8xf32>
    %53 = tpu.matmul %52, %2, %cst_29 {dimension_numbers = #tpu.dot_dimension_numbers<[2], [1], [1], [2], [0, 0, 0, 1, 1, 2], [0], [0]>} : vector<8x4x8xf32>, vector<8x8x8xf32>, vector<8x4x8xf32> -> vector<8x4x8xf32>
    "tpu.trace_stop"() : () -> ()
    %54 = tpu.transpose %53, [1, 0, 2] : vector<8x4x8xf32> -> vector<4x8x8xf32>
    %55 = arith.addf %51, %54 : vector<4x8x8xf32>
    %cst_30 = arith.constant 0.353553385 : f32
    %56 = vector.broadcast %cst_30 : f32 to vector<4x8x8xf32>
    %57 = arith.mulf %55, %56 : vector<4x8x8xf32>
    %cst_31 = arith.constant dense<0xFF800000> : vector<4x8xf32>
    %58 = vector.multi_reduction <maximumf>, %57, %cst_31 [2] : vector<4x8x8xf32> to vector<4x8xf32>
    %59 = vector.shape_cast %58 : vector<4x8xf32> to vector<4x8x1xf32>
    %60 = vector.broadcast %59 : vector<4x8x1xf32> to vector<4x8x8xf32>
    %61 = arith.subf %57, %60 : vector<4x8x8xf32>
    %62 = math.exp %61 : vector<4x8x8xf32>
    %cst_32 = arith.constant dense<0.000000e+00> : vector<4x8xf32>
    %63 = vector.multi_reduction <add>, %62, %cst_32 [2] : vector<4x8x8xf32> to vector<4x8xf32>
    %64 = vector.shape_cast %63 : vector<4x8xf32> to vector<4x8x1xf32>
    %65 = tpu.reciprocal %64 : vector<4x8x1xf32> -> vector<4x8x1xf32>
    %66 = vector.broadcast %65 : vector<4x8x1xf32> to vector<4x8x8xf32>
    %67 = arith.mulf %62, %66 : vector<4x8x8xf32>
    %68 = vector.shape_cast %67 : vector<4x8x8xf32> to vector<4x64xf32>
    %c0_33 = arith.constant 0 : index
    %c0_34 = arith.constant 0 : index
    %c0_35 = arith.constant 0 : index
    %69 = vector.load %arg20[%c0_33, %c0_34, %c0_35] : memref<2x4x64xf32, #tpu.memory_space<vmem>>, vector<1x4x64xf32>
    %70 = vector.shape_cast %69 : vector<1x4x64xf32> to vector<4x64xf32>
    %71 = vector.shape_cast %68 : vector<4x64xf32> to vector<1x4x64xf32>
    tpu.vector_store %arg20[%c0_33, %c0_34, %c0_35], %71 {strides = array<i32>} : memref<2x4x64xf32, #tpu.memory_space<vmem>>, vector<1x4x64xf32>,
    "tpu.trace_start"() <{level = 10 : i32, message = "hlr,hrd->hld"}> : () -> ()
    %cst_36 = arith.constant dense<0.000000e+00> : vector<4x8x8xf32>
    %72 = tpu.matmul %67, %50, %cst_36 {dimension_numbers = #tpu.dot_dimension_numbers<[2], [1], [1], [2], [0, 0, 0, 1, 1, 2], [0], [0]>} : vector<4x8x8xf32>, vector<4x8x8xf32>, vector<4x8x8xf32> -> vector<4x8x8xf32>
    "tpu.trace_stop"() : () -> ()
    %73 = vector.extract_strided_slice %43 {offsets = [0, 8, 0], sizes = [4, 8, 8], strides = [1, 1, 1]} : vector<4x16x8xf32> to vector<4x8x8xf32>
    %74 = vector.extract_strided_slice %45 {offsets = [0, 8, 0], sizes = [4, 8, 8], strides = [1, 1, 1]} : vector<4x16x8xf32> to vector<4x8x8xf32>
    %75 = vector.extract_strided_slice %47 {offsets = [0, 8, 0], sizes = [4, 8, 8], strides = [1, 1, 1]} : vector<4x16x8xf32> to vector<4x8x8xf32>
    "tpu.trace_start"() <{level = 10 : i32, message = "hld,hrd->hlr"}> : () -> ()
    %cst_37 = arith.constant dense<0.000000e+00> : vector<4x8x8xf32>
    %76 = tpu.matmul %73, %74, %cst_37 {dimension_numbers = #tpu.dot_dimension_numbers<[2], [2], [1], [1], [0, 0, 0, 1, 1, 1], [0], [0]>} : vector<4x8x8xf32>, vector<4x8x8xf32>, vector<4x8x8xf32> -> vector<4x8x8xf32>
    "tpu.trace_stop"() : () -> ()
    %77 = vector.extract_strided_slice %42 {offsets = [8, 0, 0], sizes = [8, 4, 8], strides = [1, 1, 1]} : vector<16x4x8xf32> to vector<8x4x8xf32>
    "tpu.trace_start"() <{level = 10 : i32, message = "lhd,ldr->lhr"}> : () -> ()
    %cst_38 = arith.constant dense<0.000000e+00> : vector<8x4x8xf32>
    %78 = tpu.matmul %77, %2, %cst_38 {dimension_numbers = #tpu.dot_dimension_numbers<[2], [1], [1], [2], [0, 0, 0, 1, 1, 2], [0], [0]>} : vector<8x4x8xf32>, vector<8x8x8xf32>, vector<8x4x8xf32> -> vector<8x4x8xf32>
    "tpu.trace_stop"() : () -> ()
    %79 = tpu.transpose %78, [1, 0, 2] : vector<8x4x8xf32> -> vector<4x8x8xf32>
    %80 = arith.addf %76, %79 : vector<4x8x8xf32>
    %cst_39 = arith.constant 0.353553385 : f32
    %81 = vector.broadcast %cst_39 : f32 to vector<4x8x8xf32>
    %82 = arith.mulf %80, %81 : vector<4x8x8xf32>
    %cst_40 = arith.constant dense<0xFF800000> : vector<4x8xf32>
    %83 = vector.multi_reduction <maximumf>, %82, %cst_40 [2] : vector<4x8x8xf32> to vector<4x8xf32>
    %84 = vector.shape_cast %83 : vector<4x8xf32> to vector<4x8x1xf32>
    %85 = vector.broadcast %84 : vector<4x8x1xf32> to vector<4x8x8xf32>
    %86 = arith.subf %82, %85 : vector<4x8x8xf32>
    %87 = math.exp %86 : vector<4x8x8xf32>
    %cst_41 = arith.constant dense<0.000000e+00> : vector<4x8xf32>
    %88 = vector.multi_reduction <add>, %87, %cst_41 [2] : vector<4x8x8xf32> to vector<4x8xf32>
    %89 = vector.shape_cast %88 : vector<4x8xf32> to vector<4x8x1xf32>
    %90 = tpu.reciprocal %89 : vector<4x8x1xf32> -> vector<4x8x1xf32>
    %91 = vector.broadcast %90 : vector<4x8x1xf32> to vector<4x8x8xf32>
    %92 = arith.mulf %87, %91 : vector<4x8x8xf32>
    %93 = vector.shape_cast %92 : vector<4x8x8xf32> to vector<4x64xf32>
    %c1 = arith.constant 1 : index
    %c0_42 = arith.constant 0 : index
    %c0_43 = arith.constant 0 : index
    %94 = vector.load %arg20[%c1, %c0_42, %c0_43] : memref<2x4x64xf32, #tpu.memory_space<vmem>>, vector<1x4x64xf32>
    %95 = vector.shape_cast %94 : vector<1x4x64xf32> to vector<4x64xf32>
    %96 = vector.shape_cast %93 : vector<4x64xf32> to vector<1x4x64xf32>
    tpu.vector_store %arg20[%c1, %c0_42, %c0_43], %96 {strides = array<i32>} : memref<2x4x64xf32, #tpu.memory_space<vmem>>, vector<1x4x64xf32>,
    "tpu.trace_start"() <{level = 10 : i32, message = "hlr,hrd->hld"}> : () -> ()
    %cst_44 = arith.constant dense<0.000000e+00> : vector<4x8x8xf32>
    %97 = tpu.matmul %92, %75, %cst_44 {dimension_numbers = #tpu.dot_dimension_numbers<[2], [1], [1], [2], [0, 0, 0, 1, 1, 2], [0], [0]>} : vector<4x8x8xf32>, vector<4x8x8xf32>, vector<4x8x8xf32> -> vector<4x8x8xf32>
    "tpu.trace_stop"() : () -> ()
    %98 = tpu.concatenate %72, %97 in 1 : vector<4x8x8xf32>, vector<4x8x8xf32> -> vector<4x16x8xf32>
    %99 = tpu.transpose %98, [1, 0, 2] : vector<4x16x8xf32> -> vector<16x4x8xf32>
    %100 = vector.shape_cast %99 : vector<16x4x8xf32> to vector<16x32xf32>
    %c0_45 = arith.constant 0 : index
    %c0_46 = arith.constant 0 : index
    %101 = vector.load %arg9[%c0_45, %c0_46] : memref<32x32xf32, #tpu.memory_space<vmem>>, vector<32x32xf32>
    %cst_47 = arith.constant dense<0.000000e+00> : vector<16x32xf32>
    %102 = tpu.matmul %100, %101, %cst_47 {dimension_numbers = #tpu.dot_dimension_numbers<[1], [0], [0], [1], [0, 0, 1, 1], [], []>} : vector<16x32xf32>, vector<32x32xf32>, vector<16x32xf32> -> vector<16x32xf32>
    %c0_48 = arith.constant 0 : index
    %c0_49 = arith.constant 0 : index
    %103 = vector.load %arg10[%c0_48, %c0_49] : memref<1x32xf32, #tpu.memory_space<vmem>>, vector<1x32xf32>
    %104 = vector.broadcast %103 : vector<1x32xf32> to vector<16x32xf32>
    %105 = arith.addf %102, %104 : vector<16x32xf32>
    %106 = arith.addf %1, %105 : vector<16x32xf32>
    %cst_50 = arith.constant dense<0.000000e+00> : vector<16xf32>
    %107 = vector.multi_reduction <add>, %106, %cst_50 [1] : vector<16x32xf32> to vector<16xf32>
    %108 = vector.shape_cast %107 : vector<16xf32> to vector<16x1xf32>
    %cst_51 = arith.constant 3.200000e+01 : f32
    %109 = vector.broadcast %cst_51 : f32 to vector<16x1xf32>
    %110 = arith.divf %108, %109 : vector<16x1xf32>
    %111 = vector.broadcast %110 : vector<16x1xf32> to vector<16x32xf32>
    %112 = arith.subf %106, %111 : vector<16x32xf32>
    %113 = arith.mulf %112, %112 : vector<16x32xf32>
    %cst_52 = arith.constant dense<0.000000e+00> : vector<16xf32>
    %114 = vector.multi_reduction <add>, %113, %cst_52 [1] : vector<16x32xf32> to vector<16xf32>
    %115 = vector.shape_cast %114 : vector<16xf32> to vector<16x1xf32>
    %cst_53 = arith.constant 3.200000e+01 : f32
    %116 = vector.broadcast %cst_53 : f32 to vector<16x1xf32>
    %117 = arith.divf %115, %116 : vector<16x1xf32>
    %118 = vector.broadcast %110 : vector<16x1xf32> to vector<16x32xf32>
    %119 = arith.subf %106, %118 : vector<16x32xf32>
    %cst_54 = arith.constant 9.99999996E-13 : f32
    %120 = vector.broadcast %cst_54 : f32 to vector<16x1xf32>
    %121 = arith.addf %117, %120 : vector<16x1xf32>
    %122 = math.rsqrt %121 : vector<16x1xf32>
    %123 = vector.broadcast %122 : vector<16x1xf32> to vector<16x32xf32>
    %124 = arith.mulf %119, %123 : vector<16x32xf32>
    %c0_55 = arith.constant 0 : index
    %c0_56 = arith.constant 0 : index
    %125 = vector.load %arg17[%c0_55, %c0_56] : memref<1x32xf32, #tpu.memory_space<vmem>>, vector<1x32xf32>
    %126 = vector.broadcast %125 : vector<1x32xf32> to vector<16x32xf32>
    %127 = arith.mulf %124, %126 : vector<16x32xf32>
    %c0_57 = arith.constant 0 : index
    %c0_58 = arith.constant 0 : index
    %128 = vector.load %arg18[%c0_57, %c0_58] : memref<1x32xf32, #tpu.memory_space<vmem>>, vector<1x32xf32>
    %129 = vector.broadcast %128 : vector<1x32xf32> to vector<16x32xf32>
    %130 = arith.addf %127, %129 : vector<16x32xf32>
    %c0_59 = arith.constant 0 : index
    %c0_60 = arith.constant 0 : index
    %131 = vector.load %arg11[%c0_59, %c0_60] : memref<32x64xf32, #tpu.memory_space<vmem>>, vector<32x64xf32>
    %cst_61 = arith.constant dense<0.000000e+00> : vector<16x64xf32>
    %132 = tpu.matmul %130, %131, %cst_61 {dimension_numbers = #tpu.dot_dimension_numbers<[1], [0], [0], [1], [0, 0, 1, 1], [], []>} : vector<16x32xf32>, vector<32x64xf32>, vector<16x64xf32> -> vector<16x64xf32>
    %c0_62 = arith.constant 0 : index
    %c0_63 = arith.constant 0 : index
    %133 = vector.load %arg12[%c0_62, %c0_63] : memref<1x64xf32, #tpu.memory_space<vmem>>, vector<1x64xf32>
    %134 = vector.broadcast %133 : vector<1x64xf32> to vector<16x64xf32>
    %135 = arith.addf %132, %134 : vector<16x64xf32>
    %cst_64 = arith.constant 5.000000e-01 : f32
    %136 = vector.broadcast %cst_64 : f32 to vector<16x64xf32>
    %137 = arith.mulf %136, %135 : vector<16x64xf32>
    %cst_65 = arith.constant 0.707106769 : f32
    %138 = vector.broadcast %cst_65 : f32 to vector<16x64xf32>
    %139 = arith.mulf %135, %138 : vector<16x64xf32>
    %140 = math.absf %139 : vector<16x64xf32>
    %cst_66 = arith.constant 0.327591091 : f32
    %141 = vector.broadcast %cst_66 : f32 to vector<16x64xf32>
    %142 = arith.mulf %141, %140 : vector<16x64xf32>
    %cst_67 = arith.constant 1.000000e+00 : f32
    %143 = vector.broadcast %cst_67 : f32 to vector<16x64xf32>
    %144 = arith.addf %143, %142 : vector<16x64xf32>
    %cst_68 = arith.constant 1.000000e+00 : f32
    %145 = vector.broadcast %cst_68 : f32 to vector<16x64xf32>
    %146 = arith.divf %145, %144 : vector<16x64xf32>
    %cst_69 = arith.constant 1.06140542 : f32
    %147 = vector.broadcast %cst_69 : f32 to vector<16x64xf32>
    %148 = arith.mulf %147, %146 : vector<16x64xf32>
    %cst_70 = arith.constant -1.45315206 : f32
    %149 = vector.broadcast %cst_70 : f32 to vector<16x64xf32>
    %150 = arith.addf %148, %149 : vector<16x64xf32>
    %151 = arith.mulf %150, %146 : vector<16x64xf32>
    %cst_71 = arith.constant 1.42141378 : f32
    %152 = vector.broadcast %cst_71 : f32 to vector<16x64xf32>
    %153 = arith.addf %151, %152 : vector<16x64xf32>
    %154 = arith.mulf %153, %146 : vector<16x64xf32>
    %cst_72 = arith.constant -0.284496725 : f32
    %155 = vector.broadcast %cst_72 : f32 to vector<16x64xf32>
    %156 = arith.addf %154, %155 : vector<16x64xf32>
    %157 = arith.mulf %156, %146 : vector<16x64xf32>
    %cst_73 = arith.constant 0.254829586 : f32
    %158 = vector.broadcast %cst_73 : f32 to vector<16x64xf32>
    %159 = arith.addf %157, %158 : vector<16x64xf32>
    %160 = arith.mulf %159, %146 : vector<16x64xf32>
    %cst_74 = arith.constant 0.000000e+00 : f32
    %161 = vector.broadcast %cst_74 : f32 to vector<16x64xf32>
    %162 = arith.subf %161, %140 : vector<16x64xf32>
    %163 = arith.mulf %162, %140 : vector<16x64xf32>
    %164 = math.exp %163 : vector<16x64xf32>
    %165 = arith.mulf %160, %164 : vector<16x64xf32>
    %cst_75 = arith.constant 1.000000e+00 : f32
    %166 = vector.broadcast %cst_75 : f32 to vector<16x64xf32>
    %167 = arith.subf %166, %165 : vector<16x64xf32>
    %cst_76 = arith.constant 0.000000e+00 : f32
    %168 = vector.broadcast %cst_76 : f32 to vector<16x64xf32>
    %169 = arith.cmpf oge, %139, %168 : vector<16x64xf32>
    %cst_77 = arith.constant 0.000000e+00 : f32
    %170 = vector.broadcast %cst_77 : f32 to vector<16x64xf32>
    %171 = arith.subf %170, %167 : vector<16x64xf32>
    %172 = arith.select %169, %167, %171 : vector<16x64xi1>, vector<16x64xf32>
    %cst_78 = arith.constant 1.000000e+00 : f32
    %173 = vector.broadcast %cst_78 : f32 to vector<16x64xf32>
    %174 = arith.addf %173, %172 : vector<16x64xf32>
    %175 = arith.mulf %137, %174 : vector<16x64xf32>
    %c0_79 = arith.constant 0 : index
    %c0_80 = arith.constant 0 : index
    %176 = vector.load %arg13[%c0_79, %c0_80] : memref<64x32xf32, #tpu.memory_space<vmem>>, vector<64x32xf32>
    %cst_81 = arith.constant dense<0.000000e+00> : vector<16x32xf32>
    %177 = tpu.matmul %175, %176, %cst_81 {dimension_numbers = #tpu.dot_dimension_numbers<[1], [0], [0], [1], [0, 0, 1, 1], [], []>} : vector<16x64xf32>, vector<64x32xf32>, vector<16x32xf32> -> vector<16x32xf32>
    %c0_82 = arith.constant 0 : index
    %c0_83 = arith.constant 0 : index
    %178 = vector.load %arg14[%c0_82, %c0_83] : memref<1x32xf32, #tpu.memory_space<vmem>>, vector<1x32xf32>
    %179 = vector.broadcast %178 : vector<1x32xf32> to vector<16x32xf32>
    %180 = arith.addf %177, %179 : vector<16x32xf32>
    %181 = arith.addf %106, %180 : vector<16x32xf32>
    %182 = vector.shape_cast %181 : vector<16x32xf32> to vector<2x8x32xf32>
    %c0_84 = arith.constant 0 : index
    %c0_85 = arith.constant 0 : index
    %c0_86 = arith.constant 0 : index
    %183 = vector.load %arg19[%c0_84, %c0_85, %c0_86] : memref<2x8x32xf32, #tpu.memory_space<vmem>>, vector<2x8x32xf32>
    tpu.vector_store %arg19[%c0_84, %c0_85, %c0_86], %182 {strides = array<i32>} : memref<2x8x32xf32, #tpu.memory_space<vmem>>, vector<2x8x32xf32>,
    return
  }
  func.func @transform_0(%arg0: i32) -> (i32, i32, i32) {
    %c0_i32 = arith.constant 0 : i32
    %c0_i32_0 = arith.constant 0 : i32
    %c0_i32_1 = arith.constant 0 : i32
    return %arg0, %c0_i32, %c0_i32_0 : i32, i32, i32
  }
  func.func @transform_1(%arg0: i32) -> (i32, i32, i32) {
    %c0_i32 = arith.constant 0 : i32
    %c0_i32_0 = arith.constant 0 : i32
    %c0_i32_1 = arith.constant 0 : i32
    %c0_i32_2 = arith.constant 0 : i32
    return %c0_i32, %c0_i32_0, %c0_i32_1 : i32, i32, i32
  }
  func.func @transform_2(%arg0: i32) -> (i32, i32) {
    %c0_i32 = arith.constant 0 : i32
    %c0_i32_0 = arith.constant 0 : i32
    %c0_i32_1 = arith.constant 0 : i32
    return %c0_i32, %c0_i32_0 : i32, i32
  }
  func.func @transform_3(%arg0: i32) -> (i32, i32) {
    %c0_i32 = arith.constant 0 : i32
    %c0_i32_0 = arith.constant 0 : i32
    %c0_i32_1 = arith.constant 0 : i32
    return %c0_i32, %c0_i32_0 : i32, i32
  }
  func.func @transform_4(%arg0: i32) -> (i32, i32) {
    %c0_i32 = arith.constant 0 : i32
    %c0_i32_0 = arith.constant 0 : i32
    %c0_i32_1 = arith.constant 0 : i32
    return %c0_i32, %c0_i32_0 : i32, i32
  }
  func.func @transform_5(%arg0: i32) -> (i32, i32) {
    %c0_i32 = arith.constant 0 : i32
    %c0_i32_0 = arith.constant 0 : i32
    %c0_i32_1 = arith.constant 0 : i32
    return %c0_i32, %c0_i32_0 : i32, i32
  }
  func.func @transform_6(%arg0: i32) -> (i32, i32) {
    %c0_i32 = arith.constant 0 : i32
    %c0_i32_0 = arith.constant 0 : i32
    %c0_i32_1 = arith.constant 0 : i32
    return %c0_i32, %c0_i32_0 : i32, i32
  }
  func.func @transform_7(%arg0: i32) -> (i32, i32) {
    %c0_i32 = arith.constant 0 : i32
    %c0_i32_0 = arith.constant 0 : i32
    %c0_i32_1 = arith.constant 0 : i32
    return %c0_i32, %c0_i32_0 : i32, i32
  }
  func.func @transform_8(%arg0: i32) -> (i32, i32) {
    %c0_i32 = arith.constant 0 : i32
    %c0_i32_0 = arith.constant 0 : i32
    %c0_i32_1 = arith.constant 0 : i32
    return %c0_i32, %c0_i32_0 : i32, i32
  }
  func.func @transform_9(%arg0: i32) -> (i32, i32) {
    %c0_i32 = arith.constant 0 : i32
    %c0_i32_0 = arith.constant 0 : i32
    %c0_i32_1 = arith.constant 0 : i32
    return %c0_i32, %c0_i32_0 : i32, i32
  }
  func.func @transform_10(%arg0: i32) -> (i32, i32) {
    %c0_i32 = arith.constant 0 : i32
    %c0_i32_0 = arith.constant 0 : i32
    %c0_i32_1 = arith.constant 0 : i32
    return %c0_i32, %c0_i32_0 : i32, i32
  }
  func.func @transform_11(%arg0: i32) -> (i32, i32) {
    %c0_i32 = arith.constant 0 : i32
    %c0_i32_0 = arith.constant 0 : i32
    %c0_i32_1 = arith.constant 0 : i32
    return %c0_i32, %c0_i32_0 : i32, i32
  }
  func.func @transform_12(%arg0: i32) -> (i32, i32) {
    %c0_i32 = arith.constant 0 : i32
    %c0_i32_0 = arith.constant 0 : i32
    %c0_i32_1 = arith.constant 0 : i32
    return %c0_i32, %c0_i32_0 : i32, i32
  }
  func.func @transform_13(%arg0: i32) -> (i32, i32) {
    %c0_i32 = arith.constant 0 : i32
    %c0_i32_0 = arith.constant 0 : i32
    %c0_i32_1 = arith.constant 0 : i32
    return %c0_i32, %c0_i32_0 : i32, i32
  }
  func.func @transform_14(%arg0: i32) -> (i32, i32) {
    %c0_i32 = arith.constant 0 : i32
    %c0_i32_0 = arith.constant 0 : i32
    %c0_i32_1 = arith.constant 0 : i32
    return %c0_i32, %c0_i32_0 : i32, i32
  }
  func.func @transform_15(%arg0: i32) -> (i32, i32) {
    %c0_i32 = arith.constant 0 : i32
    %c0_i32_0 = arith.constant 0 : i32
    %c0_i32_1 = arith.constant 0 : i32
    return %c0_i32, %c0_i32_0 : i32, i32
  }
  func.func @transform_16(%arg0: i32) -> (i32, i32) {
    %c0_i32 = arith.constant 0 : i32
    %c0_i32_0 = arith.constant 0 : i32
    %c0_i32_1 = arith.constant 0 : i32
    return %c0_i32, %c0_i32_0 : i32, i32
  }
  func.func @transform_17(%arg0: i32) -> (i32, i32) {
    %c0_i32 = arith.constant 0 : i32
    %c0_i32_0 = arith.constant 0 : i32
    %c0_i32_1 = arith.constant 0 : i32
    return %c0_i32, %c0_i32_0 : i32, i32
  }
  func.func @transform_18(%arg0: i32) -> (i32, i32, i32) {
    %c0_i32 = arith.constant 0 : i32
    %c0_i32_0 = arith.constant 0 : i32
    %c0_i32_1 = arith.constant 0 : i32
    return %arg0, %c0_i32, %c0_i32_0 : i32, i32, i32
  }
  func.func @transform_19(%arg0: i32) -> (i32, i32, i32) {
    %c0_i32 = arith.constant 0 : i32
    %c0_i32_0 = arith.constant 0 : i32
    %c0_i32_1 = arith.constant 0 : i32
    return %arg0, %c0_i32, %c0_i32_0 : i32, i32, i32
  }
}

</mosaic_0001>

<bundles_post_ra>
// kernel: transformer_layer.1
= control target key start
LH: loop header
LB: loop body
LE: loop exit
PB: predicated region body
PF: predicated region fallthrough
CT: control target
= control target key end

     0   :  { %s6264_s0 = inlined_call_operand.vmem [shape: f32[2,8,32], index: 0, kind: input, shape index: {}]   ;;  %s6265_s1 = inlined_call_operand.vmem [shape: f32[8,8,8], index: 1, kind: input, shape index: {}]   ;;  %s6266_s2 = inlined_call_operand.vmem [shape: f32[32,32], index: 2, kind: input, shape index: {}]   ;;  %s6267_s3 = inlined_call_operand.vmem [shape: f32[1,32], index: 3, kind: input, shape index: {}]   ;;  %s6268_s4 = inlined_call_operand.vmem [shape: f32[32,32], index: 4, kind: input, shape index: {}]   ;;  %s6269_s5 = inlined_call_operand.vmem [shape: f32[1,32], index: 5, kind: input, shape index: {}]   ;;  %s6270_s6 = inlined_call_operand.vmem [shape: f32[32,32], index: 6, kind: input, shape index: {}]   ;;  %s6271_s7 = inlined_call_operand.vmem [shape: f32[1,32], index: 7, kind: input, shape index: {}]   ;;  %s6272_s8 = inlined_call_operand.vmem [shape: f32[32,32], index: 8, kind: input, shape index: {}]   ;;  %s6273_s9 = inlined_call_operand.vmem [shape: f32[1,32], index: 9, kind: input, shape index: {}]   ;;  %s6274_s10 = inlined_call_operand.vmem [shape: f32[32,64], index: 10, kind: input, shape index: {}]   ;;  %s6275_s11 = inlined_call_operand.vmem [shape: f32[1,64], index: 11, kind: input, shape index: {}]   ;;  %s6276_s12 = inlined_call_operand.vmem [shape: f32[64,32], index: 12, kind: input, shape index: {}]   ;;  %s6277_s13 = inlined_call_operand.vmem [shape: f32[1,32], index: 13, kind: input, shape index: {}]   ;;  %s6278_s14 = inlined_call_operand.vmem [shape: f32[1,32], index: 14, kind: input, shape index: {}]   ;;  %s6279_s15 = inlined_call_operand.vmem [shape: f32[1,32], index: 15, kind: input, shape index: {}]   ;;  %s6280_s16 = inlined_call_operand.vmem [shape: f32[1,32], index: 16, kind: input, shape index: {}]   ;;  %s6281_s17 = inlined_call_operand.vmem [shape: f32[1,32], index: 17, kind: input, shape index: {}]   ;;  %s6282_s18 = inlined_call_operand.hbm [shape: f32[2,8,32], index: 18, kind: output, shape index: {0}]   ;;  %s6283_s19 = inlined_call_operand.vmem [shape: f32[2,4,64], index: 19, kind: output, shape index: {1}]  }
   0x1   :  { %6287 = sst [smem:[#allocation5_spill]] %s6264_s0 }
   0x2   :  { %6288 = sst [smem:[#allocation6_spill]] %s6265_s1 }
   0x3   :  { %6289 = sst [smem:[#allocation7_spill]] %s6266_s2 }
   0x4   :  { %6290 = sst [smem:[#allocation8_spill]] %s6267_s3 }
   0x5   :  { %s6291_s20 = sld [smem:[#allocation5_spill]]  ;;  %vm72_vm0 = vcmask 261120  }
   0xb   :  { %v62_v0 = vld [vmem:[%s6291_s20] sm:$0xff]  ;;  %v63_v1 = vld [vmem:[%s6291_s20 + $0x8] sm:$0xff] }
   0xc   :  { %25 = vsyncpa [#allocation3], 0  ;;  %v73_v2 = vsel %vm72_vm0, %v62_v0, 0.0  ;;  %v76_v3 = vsel %vm72_vm0, %v63_v1, 0.0  ;;  %s6292_s23 = sld [smem:[#allocation7_spill]]  ;;  %v296_v16 = vld [vmem:[%s6270_s6] sm:$0xff] }
   0xd   :  { %74 = vadd.xlane.f32.xlu0 %v73_v2  ;;  %v297_v18 = vld [vmem:[%s6270_s6 + $0x8] sm:$0xff]  ;;  %v298_v23 = vld [vmem:[%s6270_s6 + $0x10] sm:$0xff]  ;;  %v299_v24 = vld [vmem:[%s6270_s6 + $0x18] sm:$0xff]  ;;  %v5336_v57 = vmov 0.0   ;;  %s5337_s26 = smov 112   ;;  %s5338_s6 = smov 120  }
   0xe   :  { %v5206_v21 = vpack.c.bf16 %v297_v18, %v296_v16  ;;  %v5210_v25 = vpack.c.bf16 %v299_v24, %v298_v23  ;;  %v210_v26 = vld [vmem:[%s6268_s4] sm:$0xff]  ;;  %v211_v27 = vld [vmem:[%s6268_s4 + $0x8] sm:$0xff]  ;;  %v212_v43 = vld [vmem:[%s6268_s4 + $0x10] sm:$0xff]  ;;  %vm5339_vm1 = vmmov 0   ;;  %s5340_s29 = smov 104   ;;  %vm1258_vm2 = vcmask 64512  }
   0xf   :  { %v5198_v28 = vpack.c.bf16 %v211_v27, %v210_v26  ;;  %v4773_v36 = vld [vmem:[%s6278_s14] ss:$0 sm:$0xff]  ;;  %v213_v44 = vld [vmem:[%s6268_s4 + $0x18] sm:$0xff]  ;;  %s5345_s3 = smov 24   ;;  %vm2360_vm3 = vcmask 130048   ;;  %vm2362_vm4 = vcmask 195584  }
  0x10   :  { %5207 = vmatprep.subr.bf16.mxu0 %v5206_v21  ;;  %v4774_v38 = vld [vmem:[%s6279_s15] ss:$0 sm:$0xff]  ;;  %v5202_v47 = vpack.c.bf16 %v213_v44, %v212_v43  ;;  %s6293_s15 = sld [smem:[#allocation8_spill]]  ;;  %s5348_s22 = smov 48   ;;  %vm2365_vm5 = vcmask 326656   ;;  %vm2367_vm6 = vcmask 392192  }
  0x11   :  { %77 = vadd.xlane.f32.xlu0 %v76_v3  ;;  %5209 = vmatpush3.bf16.msra.mxu0 %v5206_v21  ;;  %v5516_v49 = vld [vmem:[%s6271_s7] ss:$0 sm:$0xff]  ;;  %s6294_s7 = sld [smem:[#allocation6_spill]]  ;;  %v407_v3 = vlaneseq  ;;  %s5349_s2 = smov 56   ;;  %vm2369_vm7 = vcmask 457728   ;;  %vm2371_vm8 = vcmask 519168  }
  0x12   :  { %v118_v14 = vld [vmem:[%s6292_s23] sm:$0xff]  ;;  %v119_v15 = vld [vmem:[%s6292_s23 + $0x8] sm:$0xff]  ;;  %v120_v19 = vld [vmem:[%s6292_s23 + $0x10] sm:$0xff]  ;;  %5211 = vmatprep.subr.bf16.mxu0 %v5210_v25  ;;  %vm4667_vm11 = vcmask 523264  }
  0x13   :  { %v5190_v17 = vpack.c.bf16 %v119_v15, %v118_v14  ;;  %v121_v20 = vld [vmem:[%s6292_s23 + $0x18] sm:$0xff]  ;;  %v4778_v60 = vld [vmem:[%s6269_s5] ss:$0 sm:$0xff]  ;;  %s5344_s23 = smov 16  }
  0x14   :  { %v5194_v22 = vpack.c.bf16 %v121_v20, %v120_v19 }
  0x15   :  { %5191 = vmatprep.subr.bf16.mxu1 %v5190_v17  ;;  %5213 = vmatpush3.bf16.msra.mxu0 %v5210_v25 }
  0x16   :  { %5193 = vmatpush3.bf16.msra.mxu1 %v5190_v17  ;;  %v4775_v48 = vld [vmem:[%s6293_s15] ss:$0 sm:$0xff]  ;;  %4999 = vmatprep.subr.mxu0 %v5336_v57 }
  0x17   :  { %5195 = vmatprep.subr.bf16.mxu1 %v5194_v22  ;;  %v5530_v58 = vld [vmem:[%s6294_s7] sm:$0xff]  ;;  %v5535_v59 = vld [vmem:[%s6294_s7 + $0x10] sm:$0xff] }
  0x1a   :  { %5197 = vmatpush3.bf16.msra.mxu1 %v5194_v22 }
  0x1b   :  { %5199 = vmatprep.subr.bf16.mxu1 %v5198_v28 }
  0x9a   :  { %v75_v4 = vpop.xlane.xlu0 %74 }
  0x9b   :  { %v80_v5 = vmul.f32 0.03125, %v75_v4  ;;  %v5342_v4 = vmov 1934713408  }
  0x9d   :  { %v82_v6 = vsub.f32 %v62_v0, %v80_v5  ;;  %v437_v5 = vunpack.c.l.s4 %v5342_v4 }
  0x9e   :  { %v78_v7 = vpop.xlane.xlu0 %77 }
  0x9f   :  { %v81_v8 = vmul.f32 0.03125, %v78_v7  ;;  %v84_v9 = vmul.f32 %v82_v6, %v82_v6  ;;  %v408_v7 = vshrl.u32 %v407_v3, 7 }
  0xa1   :  { %v83_v10 = vsub.f32 %v63_v1, %v81_v8  ;;  %v86_v11 = vsel %vm72_vm0, %v84_v9, 0.0  ;;  %v5341_v1 = vmov 1983009808   ;;  %v438_v9 = vunpack.c.0.s8 %v437_v5 }
  0xa2   :  { %87 = vadd.xlane.f32.xlu1 %v86_v11  ;;  %v405_v2 = vunpack.c.l.s4 %v5341_v1 }
  0xa3   :  { %v85_v12 = vmul.f32 %v83_v10, %v83_v10  ;;  %v5558_v17 = vsub.s32 %v438_v9, %v408_v7 }
  0xa5   :  { %v89_v13 = vsel %vm72_vm0, %v85_v12, 0.0 }
  0xa6   :  { %90 = vadd.xlane.f32.xlu1 %v89_v13 }
 0x12f   :  { %v88_v29 = vpop.xlane.xlu1 %87 }
 0x130   :  { %v92_v30 = vmul.f32 0.03125, %v88_v29 }
 0x132   :  { %v94_v31 = vadd.f32 1e-12, %v92_v30 }
 0x133   :  { %v91_v32 = vpop.xlane.xlu1 %90 }
 0x134   :  { %5262 = vrsqrt.f32 %v94_v31  ;;  %v93_v33 = vmul.f32 0.03125, %v91_v32  ;;  %v5569_v31 = vld [vmem:[%s6294_s7 + $0x8] sm:$0xff] }
 0x136   :  { %v95_v34 = vadd.f32 1e-12, %v93_v33 }
 0x138   :  { %5264 = vrsqrt.f32 %v95_v34 }
 0x13e   :  { %v5263_v35 = vpop.eup %5262 }
 0x13f   :  { %v98_v37 = vmul.f32 %v5263_v35, %v82_v6  ;;  %v406_v6 = vunpack.c.0.s8 %v405_v2 }
 0x141   :  { %v107_v39 = vmul.f32 %v4773_v36, %v98_v37 }
 0x142   :  { %v5265_v40 = vpop.eup %5264 }
 0x143   :  { %v99_v41 = vmul.f32 %v5265_v40, %v83_v10  ;;  %v116_v42 = vadd.f32 %v4774_v38, %v107_v39  ;;  %v5556_v10 = vsub.s32 %v406_v6, %v408_v7  ;;  %v5627_v7 = vld [vmem:[%s6294_s7 + $0x28] sm:$0xff] }
 0x145   :  { %v108_v45 = vmul.f32 %v4773_v36, %v99_v41  ;;  %4964 = vmatprep.mubr.msk.f32.mxu1 %vm72_vm0, %v116_v42  ;;  %4986 = vmatprep.mubr.msk.f32.mxu0 %vm72_vm0, %v116_v42  ;;  %v5579_v36 = vld [vmem:[%s6294_s7 + $0x20] sm:$0xff] }
 0x147   :  { %v117_v46 = vadd.f32 %v4774_v38, %v108_v45  ;;  %v5596_v45 = vld [vmem:[%s6294_s7 + $0x18] sm:$0xff] }
 0x149   :  { %4965 = vmatmul.mubr.msk.f32.vlgmr.msra.gmra.mrb[0].mxu1 %vm72_vm0, %v117_v46  ;;  %4987 = vmatmul.mubr.msk.f32.vlgmr.msra.gmra.mrb[0].mxu0 %vm72_vm0, %v117_v46 }
 0x14a   :  { %5201 = vmatpush3.bf16.msra.mxu1 %v5198_v28  ;;  %4975 = vmatprep.mubr.msk.f32.mxu1 %vm72_vm0, %v116_v42 }
 0x14b   :  { %5203 = vmatprep.subr.bf16.mxu1 %v5202_v47  ;;  %5000 = vmatpush3.msra.mxu0 %v5535_v59 }
 0x14c   :  { %5001 = vmatprep.mubr.msk.f32.mxu0 %vm5339_vm1, %v5336_v57  ;;  %5009 = vmatprep.subr.mxu0 %v5336_v57 }
 0x14e   :  { %5205 = vmatpush3.bf16.msra.mxu1 %v5202_v47 }
 0x14f   :  { %4989 = vmatprep.subr.mxu1 %v5336_v57 }
 0x151   :  { %4976 = vmatmul.mubr.msk.f32.vlgmr.msra.gmra.mrb[2].mxu1 %vm72_vm0, %v117_v46 }
 0x152   :  { %4990 = vmatpush3.msra.mxu1 %v5530_v58  ;;  %4991 = vmatprep.mubr.msk.f32.mxu1 %vm5339_vm1, %v5336_v57 }
 0x153   :  { %4994 = vmatprep.subr.mxu1 %v5336_v57 }
 0x21c   :  { %v4966_v50 = vpop.f32.mrb[0].mxu1  ;;  %v4988_v51 = vpop.f32.mrb[0].mxu0 }
 0x21d   :  { %v5518_v52 = vadd.f32 %v4966_v50, %v4775_v48  ;;  %v5521_v53 = vadd.f32 %v4988_v51, %v5516_v49  ;;  %v201_v54 = vpop.f32.mrb[1].mxu1  ;;  %v5523_v55 = vpop.f32.mrb[1].mxu0 }
 0x21e   :  { %v202_v56 = vadd.f32 %v4775_v48, %v201_v54 }
 0x220   :  { %390 = vrot.lane.b32.xlu1 %v202_v56, %s5337_s26  ;;  %384 = vrot.lane.b32.xlu0 %v202_v56, %s5338_s6 }
 0x224   :  { %v4977_v61 = vpop.f32.mrb[2].mxu1  ;;  %396 = vrot.lane.b32.xlu1 %v202_v56, %s5340_s29 }
 0x225   :  { %v5551_v62 = vadd.f32 %v4977_v61, %v4778_v60  ;;  %v287_v63 = vpop.f32.mrb[3].mxu1 }
 0x226   :  { %v288_v0 = vadd.f32 %v4778_v60, %v287_v63  ;;  %v5606_v60 = vld [vmem:[%s6294_s7 + $0x30] sm:$0xff] }
 0x228   :  { %682 = vrot.lane.b32.xlu0 %v288_v0, %s5337_s26  ;;  %676 = vrot.lane.b32.xlu1 %v288_v0, %s5338_s6 }
 0x22c   :  { %688 = vrot.lane.b32.xlu1 %v288_v0, %s5340_s29 }
 0x292   :  { %v391_v8 = vpop.permute.xlu1 %390  ;;  %v385_v13 = vpop.permute.xlu0 %384 }
 0x293   :  { %v402_v11 = vcombine.low %v202_v56, %v391_v8  ;;  %v403_v12 = vcombine.high %v202_v56, %v391_v8 }
 0x295   :  { %v410_v18 = vrot.slane %v402_v11, %v5556_v10  ;;  %v417_v19 = vrot.slane %v403_v12, %v5556_v10 }
 0x296   :  { %v397_v14 = vpop.permute.xlu1 %396 }
 0x297   :  { %v418_v15 = vcombine.low %v385_v13, %v397_v14  ;;  %v419_v16 = vcombine.high %v385_v13, %v397_v14 }
 0x299   :  { %v426_v20 = vrot.slane %v418_v15, %v5556_v10  ;;  %v433_v21 = vrot.slane %v419_v16, %v5556_v10 }
 0x29a   :  { %v683_v22 = vpop.permute.xlu0 %682  ;;  %v677_v23 = vpop.permute.xlu1 %676 }
 0x29b   :  { %v434_v24 = vcombine.low %v410_v18, %v426_v20  ;;  %v435_v25 = vcombine.high %v410_v18, %v426_v20  ;;  %v450_v26 = vcombine.low %v417_v19, %v433_v21  ;;  %v451_v27 = vcombine.high %v417_v19, %v433_v21  ;;  %v5642_v19 = vld [vmem:[%s6294_s7 + $0x38] sm:$0xff]  ;;  %s5343_s7 = smov 8  }
 0x29c   :  { %v694_v30 = vcombine.low %v288_v0, %v683_v22  ;;  %v695_v32 = vcombine.high %v288_v0, %v683_v22 }
 0x29d   :  { %v442_v28 = vrot.slane %v434_v24, %v5558_v17  ;;  %v449_v29 = vrot.slane %v435_v25, %v5558_v17  ;;  %v458_v34 = vrot.slane %v450_v26, %v5558_v17  ;;  %v5573_v35 = vrot.slane %v451_v27, %v5558_v17 }
 0x29e   :  { %v689_v33 = vpop.permute.xlu1 %688  ;;  %v702_v40 = vrot.slane %v694_v30, %v5556_v10  ;;  %v709_v42 = vrot.slane %v695_v32, %v5556_v10 }
 0x29f   :  { %4992 = vmatmul.mubr.msk.f32.vlgmr.msra.gmra.mrb[4].mxu1 %vm1258_vm2, %v442_v28  ;;  %v710_v37 = vcombine.low %v677_v23, %v689_v33  ;;  %v711_v38 = vcombine.high %v677_v23, %v689_v33  ;;  %5002 = vmatmul.mubr.msk.f32.vlgmr.msra.gmra.mrb[2].mxu0 %vm1258_vm2, %v449_v29  ;;  %v538_v39 = vcombine.low %v442_v28, %v449_v29 }
 0x2a0   :  { %4995 = vmatpush3.msra.mxu1 %v5569_v31  ;;  %4996 = vmatprep.mubr.msk.f32.mxu1 %vm5339_vm1, %v5336_v57  ;;  %v466_v41 = vcombine.high %v442_v28, %v5336_v57  ;;  %v4784_v46 = vcombine.high %v442_v28, %v449_v29  ;;  %v554_v47 = vcombine.low %v458_v34, %v5573_v35 }
 0x2a1   :  { %v718_v43 = vrot.slane %v710_v37, %v5556_v10  ;;  %v725_v44 = vrot.slane %v711_v38, %v5556_v10  ;;  %5010 = vmatpush3.msra.mxu0 %v5579_v36  ;;  %5011 = vmatprep.mubr.msk.f32.mxu0 %vm5339_vm1, %v5336_v57  ;;  %v4785_v48 = vcombine.high %v458_v34, %v5573_v35 }
 0x2a2   :  { %5004 = vmatprep.subr.mxu1 %v5336_v57  ;;  %v545_v61 = vrot.slane %v538_v39, %v5556_v10  ;;  %5019 = vmatprep.subr.mxu0 %v5336_v57  ;;  %v467_v63 = vcombine.high %v449_v29, %v5336_v57  ;;  %v553_v4 = vrot.slane %v4784_v46, %v5556_v10 }
 0x2a3   :  { %4997 = vmatmul.mubr.msk.f32.vlgmr.msra.gmra.mrb[6].mxu1 %vm1258_vm2, %v466_v41  ;;  %v726_v50 = vcombine.low %v702_v40, %v718_v43  ;;  %v727_v51 = vcombine.high %v702_v40, %v718_v43  ;;  %v742_v54 = vcombine.low %v709_v42, %v725_v44  ;;  %v743_v56 = vcombine.high %v709_v42, %v725_v44 }
 0x2a4   :  { %5012 = vmatmul.mubr.msk.f32.vlgmr.msra.gmra.mrb[4].mxu0 %vm1258_vm2, %v458_v34  ;;  %5005 = vmatpush3.msra.mxu1 %v5596_v45  ;;  %v561_v5 = vrot.slane %v554_v47, %v5556_v10  ;;  %v569_v6 = vrot.slane %v4785_v48, %v5556_v10  ;;  %v468_v13 = vcombine.high %v458_v34, %v5336_v57 }
 0x2a5   :  { %v734_v0 = vrot.slane %v726_v50, %v5558_v17  ;;  %v741_v1 = vrot.slane %v727_v51, %v5558_v17  ;;  %v750_v2 = vrot.slane %v742_v54, %v5558_v17  ;;  %v757_v3 = vrot.slane %v743_v56, %v5558_v17  ;;  %5006 = vmatprep.mubr.msk.f32.mxu1 %vm5339_vm1, %v5336_v57 }
 0x2a6   :  { %5020 = vmatpush3.msra.mxu0 %v5606_v60  ;;  %5021 = vmatprep.mubr.msk.f32.mxu0 %vm5339_vm1, %v5336_v57  ;;  %v570_v20 = vcombine.low %v545_v61, %v553_v4  ;;  %v586_v21 = vcombine.low %v561_v5, %v569_v6  ;;  %v469_v26 = vcombine.high %v5573_v35, %v5336_v57 }
 0x2a7   :  { %v830_v8 = vcombine.low %v734_v0, %v741_v1  ;;  %v4788_v9 = vcombine.high %v734_v0, %v741_v1  ;;  %v846_v11 = vcombine.low %v750_v2, %v757_v3  ;;  %v4789_v12 = vcombine.high %v750_v2, %v757_v3  ;;  %5007 = vmatmul.mubr.msk.f32.vlgmr.msra.gmra.mrb[8].mxu1 %vm1258_vm2, %v467_v63 }
 0x2a8   :  { %5022 = vmatmul.mubr.msk.f32.vlgmr.msra.gmra.mrb[6].mxu0 %vm1258_vm2, %v5573_v35  ;;  %5014 = vmatprep.subr.mxu1 %v5336_v57  ;;  %v578_v29 = vrot.slane %v570_v20, %v5558_v17  ;;  %v594_v30 = vrot.slane %v586_v21, %v5558_v17  ;;  %v571_v32 = vcombine.high %v545_v61, %v553_v4 }
 0x2a9   :  { %v837_v14 = vrot.slane %v830_v8, %v5556_v10  ;;  %v845_v15 = vrot.slane %v4788_v9, %v5556_v10  ;;  %v853_v16 = vrot.slane %v846_v11, %v5556_v10  ;;  %v861_v18 = vrot.slane %v4789_v12, %v5556_v10  ;;  %5015 = vmatpush3.msra.mxu1 %v5627_v7 }
 0x2aa   :  { %5016 = vmatprep.mubr.msk.f32.mxu1 %vm5339_vm1, %v5336_v57  ;;  %5024 = vmatprep.subr.mxu1 %v5336_v57  ;;  %v587_v33 = vcombine.high %v561_v5, %v569_v6  ;;  %v602_v39 = vcombine.low %v578_v29, %v594_v30  ;;  %v585_v40 = vrot.slane %v571_v32, %v5558_v17 }
 0x2ab   :  { %v862_v22 = vcombine.low %v837_v14, %v845_v15  ;;  %v863_v23 = vcombine.high %v837_v14, %v845_v15  ;;  %v878_v24 = vcombine.low %v853_v16, %v861_v18  ;;  %v879_v25 = vcombine.high %v853_v16, %v861_v18  ;;  %5017 = vmatmul.mubr.msk.f32.vlgmr.msra.gmra.mrb[10].mxu1 %vm1258_vm2, %v468_v13 }
 0x2ac   :  { %5025 = vmatpush3.msra.mxu1 %v5642_v19  ;;  %5026 = vmatprep.mubr.msk.f32.mxu1 %vm5339_vm1, %v5336_v57  ;;  %v601_v41 = vrot.slane %v587_v33, %v5558_v17  ;;  %v603_v43 = vcombine.high %v578_v29, %v594_v30 }
 0x2ad   :  { %5029 = vmatprep.subr.mxu0 %v5336_v57  ;;  %v870_v27 = vrot.slane %v862_v22, %v5558_v17  ;;  %v886_v28 = vrot.slane %v878_v24, %v5558_v17  ;;  %5034 = vmatprep.subr.mxu1 %v5336_v57  ;;  %v877_v37 = vrot.slane %v863_v23, %v5558_v17 }
 0x2ae   :  { %5031 = vmatprep.mubr.msk.f32.mxu0 %vm5339_vm1, %v5336_v57  ;;  %v893_v38 = vrot.slane %v879_v25, %v5558_v17  ;;  %v604_v46 = vcombine.low %v585_v40, %v601_v41  ;;  %v605_v47 = vcombine.high %v585_v40, %v601_v41 }
 0x2af   :  { %5027 = vmatmul.mubr.msk.f32.vlgmr.msra.gmra.mrb[12].mxu1 %vm1258_vm2, %v469_v26  ;;  %v894_v34 = vcombine.low %v870_v27, %v886_v28  ;;  %v895_v35 = vcombine.high %v870_v27, %v886_v28 }
 0x2b0   :  { %5036 = vmatprep.mubr.msk.f32.mxu1 %vm5339_vm1, %v5336_v57  ;;  %v896_v42 = vcombine.low %v877_v37, %v893_v38  ;;  %v897_v44 = vcombine.high %v877_v37, %v893_v38 }
 0x2b1   :  { %5030 = vmatpush3.xpose.msk.msra.mxu0 %vm1258_vm2, %v894_v34 }
 0x2b2   :  { %5039 = vmatprep.subr.mxu0 %v5336_v57 }
 0x2b3   :  { %5035 = vmatpush3.xpose.msk.msra.mxu1 %vm1258_vm2, %v895_v35 }
 0x2b4   :  { %5032 = vmatmul.mubr.msk.f32.vlgmr.msra.gmra.mrb[8].mxu0 %vm1258_vm2, %v602_v39  ;;  %5044 = vmatprep.subr.mxu1 %v5336_v57 }
 0x2b5   :  { %5040 = vmatpush3.xpose.msk.msra.mxu0 %vm1258_vm2, %v896_v42  ;;  %5041 = vmatprep.mubr.msk.f32.mxu0 %vm5339_vm1, %v5336_v57 }
 0x2b6   :  { %5037 = vmatmul.mubr.msk.f32.vlgmr.msra.gmra.mrb[14].mxu1 %vm1258_vm2, %v603_v43  ;;  %5049 = vmatprep.subr.mxu0 %v5336_v57 }
 0x2b7   :  { %5045 = vmatpush3.xpose.msk.msra.mxu1 %vm1258_vm2, %v897_v44  ;;  %5046 = vmatprep.mubr.msk.f32.mxu1 %vm5339_vm1, %v5336_v57 }
 0x2b8   :  { %5042 = vmatmul.mubr.msk.f32.vlgmr.msra.gmra.mrb[10].mxu0 %vm1258_vm2, %v604_v46  ;;  %5054 = vmatprep.subr.mxu1 %v5336_v57 }
 0x2b9   :  { %5051 = vmatprep.mubr.msk.f32.mxu0 %vm5339_vm1, %v5336_v57 }
 0x2ba   :  { %5047 = vmatmul.mubr.msk.f32.vlgmr.msra.gmra.mrb[16].mxu1 %vm1258_vm2, %v605_v47 }
 0x2bb   :  { %5056 = vmatprep.mubr.msk.f32.mxu1 %vm5339_vm1, %v5336_v57 }
 0x372   :  { %v1328_v48 = vpop.f32.mrb[4].mxu1  ;;  %v1474_v50 = vpop.f32.mrb[2].mxu0 }
 0x373   :  { %v4993_v51 = vpop.f32.mrb[5].mxu1  ;;  %v1843_v54 = vcombine.low %v1328_v48, %v1474_v50  ;;  %v5003_v56 = vpop.f32.mrb[3].mxu0 }
 0x375   :  { %v1850_v9 = vrot.slane %v1843_v54, %v5556_v10 }
 0x376   :  { %v1401_v61 = vpop.f32.mrb[6].mxu1 }
 0x377   :  { %v1620_v63 = vpop.f32.mrb[4].mxu0  ;;  %v4998_v0 = vpop.f32.mrb[7].mxu1 }
 0x378   :  { %v5013_v1 = vpop.f32.mrb[5].mxu0 }
 0x379   :  { %v374_v1 = vadd.f32 %v5516_v49, %v5523_v55 }
 0x37a   :  { %v1547_v2 = vpop.f32.mrb[8].mxu1 }
 0x37b   :  { %v1851_v3 = vcombine.low %v1401_v61, %v1547_v2  ;;  %v1766_v4 = vpop.f32.mrb[6].mxu0  ;;  %v5008_v5 = vpop.f32.mrb[9].mxu1 }
 0x37c   :  { %v1859_v6 = vcombine.low %v1620_v63, %v1766_v4  ;;  %v5023_v8 = vpop.f32.mrb[7].mxu0 }
 0x37d   :  { %v1858_v11 = vrot.slane %v1851_v3, %v5556_v10 }
 0x37e   :  { %v1693_v12 = vpop.f32.mrb[10].mxu1  ;;  %v1866_v21 = vrot.slane %v1859_v6, %v5556_v10 }
 0x37f   :  { %v1875_v13 = vcombine.low %v1850_v9, %v1858_v11  ;;  %v1876_v14 = vcombine.high %v1850_v9, %v1858_v11  ;;  %v5018_v15 = vpop.f32.mrb[11].mxu1 }
 0x381   :  { %v1883_v27 = vrot.slane %v1875_v13, %v5558_v17  ;;  %v1890_v30 = vrot.slane %v1876_v14, %v5558_v17 }
 0x382   :  { %v1839_v16 = vpop.f32.mrb[12].mxu1 }
 0x383   :  { %v1867_v18 = vcombine.low %v1693_v12, %v1839_v16  ;;  %v5028_v20 = vpop.f32.mrb[13].mxu1 }
 0x385   :  { %v1874_v22 = vrot.slane %v1867_v18, %v5556_v10 }
 0x387   :  { %v1891_v23 = vcombine.low %v1866_v21, %v1874_v22  ;;  %v1892_v24 = vcombine.high %v1866_v21, %v1874_v22  ;;  %v1983_v25 = vpop.f32.mrb[8].mxu0 }
 0x388   :  { %v5033_v26 = vpop.f32.mrb[9].mxu0 }
 0x389   :  { %v1899_v28 = vrot.slane %v1891_v23, %v5558_v17  ;;  %v2059_v29 = vpop.f32.mrb[14].mxu1  ;;  %v1906_v32 = vrot.slane %v1892_v24, %v5558_v17 }
 0x38a   :  { %v5038_v33 = vpop.f32.mrb[15].mxu1 }
 0x38b   :  { %v1907_v34 = vcombine.low %v1883_v27, %v1899_v28  ;;  %v1908_v35 = vcombine.high %v1883_v27, %v1899_v28  ;;  %v1909_v37 = vcombine.low %v1890_v30, %v1906_v32  ;;  %v2135_v38 = vpop.f32.mrb[10].mxu0  ;;  %v1910_v39 = vcombine.high %v1890_v30, %v1906_v32 }
 0x38c   :  { %v5043_v40 = vpop.f32.mrb[11].mxu0 }
 0x38d   :  { %v1984_v41 = vadd.f32 %v1983_v25, %v1907_v34  ;;  %v2060_v42 = vadd.f32 %v2059_v29, %v1908_v35  ;;  %v2136_v43 = vadd.f32 %v2135_v38, %v1909_v37  ;;  %v2211_v44 = vpop.f32.mrb[16].mxu1 }
 0x38e   :  { %v2212_v46 = vadd.f32 %v2211_v44, %v1910_v39  ;;  %v5048_v47 = vpop.f32.mrb[17].mxu1 }
 0x38f   :  { %v2215_v48 = vmul.f32 0.35355338, %v1984_v41  ;;  %v2216_v50 = vmul.f32 0.35355338, %v2060_v42  ;;  %v2217_v51 = vmul.f32 0.35355338, %v2136_v43 }
 0x390   :  { %v2218_v61 = vmul.f32 0.35355338, %v2212_v46 }
 0x391   :  { %v2222_v54 = vsel %vm1258_vm2, %v2216_v50, -inf  ;;  %v2219_v56 = vsel %vm1258_vm2, %v2215_v48, -inf  ;;  %v2225_v63 = vsel %vm1258_vm2, %v2217_v51, -inf }
 0x392   :  { %2223 = vmax.xlane.f32.xlu1 %v2222_v54  ;;  %2220 = vmax.xlane.f32.xlu0 %v2219_v56  ;;  %v2228_v0 = vsel %vm1258_vm2, %v2218_v61, -inf }
 0x396   :  { %2226 = vmax.xlane.f32.xlu0 %v2225_v63 }
 0x39a   :  { %2229 = vmax.xlane.f32.xlu0 %v2228_v0 }
 0x3a3   :  { %974 = vrot.lane.b32.xlu1 %v374_v1, %s5337_s26 }
 0x3a7   :  { %980 = vrot.lane.b32.xlu1 %v374_v1, %s5340_s29 }
 0x3ab   :  { %386 = vrot.lane.b32.xlu1 %v5518_v52, %s5338_s6 }
 0x3af   :  { %398 = vrot.lane.b32.xlu1 %v5518_v52, %s5340_s29 }
 0x3b0   :  { %968 = vrot.lane.b32.xlu0 %v374_v1, %s5338_s6 }
 0x3b4   :  { %392 = vrot.lane.b32.xlu0 %v5518_v52, %s5337_s26 }
 0x41f   :  { %v2224_v2 = vpop.xlane.xlu1 %2223  ;;  %v2221_v3 = vpop.xlane.xlu0 %2220 }
 0x420   :  { %v2232_v4 = vsub.f32 %v2216_v50, %v2224_v2  ;;  %v2231_v49 = vsub.f32 %v2215_v48, %v2221_v3 }
 0x422   :  { %v2237_v5 = vmul.f32 1.442695, %v2232_v4  ;;  %v2235_v9 = vmul.f32 1.442695, %v2231_v49 }
 0x423   :  { %v2227_v55 = vpop.xlane.xlu0 %2226  ;;  %v975_v8 = vpop.permute.xlu1 %974 }
 0x424   :  { %5266 = vpow2.f32 %v2237_v5  ;;  %v2233_v6 = vsub.f32 %v2217_v51, %v2227_v55  ;;  %v986_v14 = vcombine.low %v374_v1, %v975_v8  ;;  %v987_v15 = vcombine.high %v374_v1, %v975_v8 }
 0x425   :  { %5268 = vpow2.f32 %v2235_v9 }
 0x426   :  { %v2239_v11 = vmul.f32 1.442695, %v2233_v6  ;;  %v994_v24 = vrot.slane %v986_v14, %v5556_v10  ;;  %v1001_v25 = vrot.slane %v987_v15, %v5556_v10 }
 0x427   :  { %v2230_v12 = vpop.xlane.xlu0 %2229  ;;  %v981_v18 = vpop.permute.xlu1 %980 }
 0x428   :  { %v2234_v13 = vsub.f32 %v2218_v61, %v2230_v12  ;;  %5270 = vpow2.f32 %v2239_v11 }
 0x42a   :  { %v2241_v16 = vmul.f32 1.442695, %v2234_v13 }
 0x42b   :  { %v969_v20 = vpop.permute.xlu0 %968  ;;  %v387_v11 = vpop.permute.xlu1 %386 }
 0x42c   :  { %5272 = vpow2.f32 %v2241_v16  ;;  %v1002_v21 = vcombine.low %v969_v20, %v981_v18  ;;  %v1003_v22 = vcombine.high %v969_v20, %v981_v18 }
 0x42e   :  { %v5711_v23 = vpop.eup %5266  ;;  %v1010_v26 = vrot.slane %v1002_v21, %v5556_v10  ;;  %v1017_v27 = vrot.slane %v1003_v22, %v5556_v10 }
 0x42f   :  { %v2246_v28 = vsel %vm1258_vm2, %v5711_v23, 0.0  ;;  %v5723_v39 = vpop.eup %5268  ;;  %v399_v12 = vpop.permute.xlu1 %398 }
 0x430   :  { %v1018_v29 = vcombine.low %v994_v24, %v1010_v26  ;;  %v1019_v30 = vcombine.high %v994_v24, %v1010_v26  ;;  %v1034_v32 = vcombine.low %v1001_v25, %v1017_v27  ;;  %v1035_v33 = vcombine.high %v1001_v25, %v1017_v27  ;;  %2247 = vadd.xlane.f32.xlu1 %v2246_v28  ;;  %v393_v14 = vpop.permute.xlu0 %392 }
 0x431   :  { %v2243_v54 = vsel %vm1258_vm2, %v5723_v39, 0.0  ;;  %v486_v15 = vcombine.low %v387_v11, %v399_v12  ;;  %v470_v16 = vcombine.low %v5518_v52, %v393_v14  ;;  %v487_v20 = vcombine.high %v387_v11, %v399_v12 }
 0x432   :  { %v1026_v34 = vrot.slane %v1018_v29, %v5558_v17  ;;  %v1033_v35 = vrot.slane %v1019_v30, %v5558_v17  ;;  %v1042_v37 = vrot.slane %v1034_v32, %v5558_v17  ;;  %v1049_v38 = vrot.slane %v1035_v33, %v5558_v17  ;;  %v5725_v44 = vpop.eup %5270  ;;  %2244 = vadd.xlane.f32.xlu0 %v2243_v54 }
 0x433   :  { %v2249_v63 = vsel %vm1258_vm2, %v5725_v44, 0.0  ;;  %v494_v24 = vrot.slane %v486_v15, %v5556_v10  ;;  %v471_v25 = vcombine.high %v5518_v52, %v393_v14  ;;  %v478_v26 = vrot.slane %v470_v16, %v5556_v10 }
 0x434   :  { %v1122_v40 = vcombine.low %v1026_v34, %v1033_v35  ;;  %v4792_v41 = vcombine.high %v1026_v34, %v1033_v35  ;;  %v1138_v42 = vcombine.low %v1042_v37, %v1049_v38  ;;  %v4793_v43 = vcombine.high %v1042_v37, %v1049_v38 }
 0x435   :  { %v501_v29 = vrot.slane %v487_v20, %v5556_v10  ;;  %v485_v32 = vrot.slane %v471_v25, %v5556_v10  ;;  %v502_v33 = vcombine.low %v478_v26, %v494_v24  ;;  %v503_v34 = vcombine.high %v478_v26, %v494_v24 }
 0x436   :  { %v5727_v46 = vpop.eup %5272  ;;  %v1129_v47 = vrot.slane %v1122_v40, %v5556_v10  ;;  %v1137_v48 = vrot.slane %v4792_v41, %v5556_v10  ;;  %v1145_v50 = vrot.slane %v1138_v42, %v5556_v10  ;;  %v1153_v51 = vrot.slane %v4793_v43, %v5556_v10  ;;  %2250 = vadd.xlane.f32.xlu0 %v2249_v63 }
 0x437   :  { %v2252_v56 = vsel %vm1258_vm2, %v5727_v46, 0.0  ;;  %v5776_v37 = vrot.slane %v502_v33, %v5558_v17  ;;  %v5779_v38 = vrot.slane %v503_v34, %v5558_v17  ;;  %v518_v40 = vcombine.low %v485_v32, %v501_v29 }
 0x438   :  { %v1154_v61 = vcombine.low %v1129_v47, %v1137_v48  ;;  %2253 = vadd.xlane.f32.xlu1 %v2252_v56  ;;  %v1170_v1 = vcombine.low %v1145_v50, %v1153_v51  ;;  %v1155_v2 = vcombine.high %v1129_v47, %v1137_v48  ;;  %v1171_v3 = vcombine.high %v1145_v50, %v1153_v51 }
 0x439   :  { %v519_v41 = vcombine.high %v485_v32, %v501_v29 }
 0x43a   :  { %v1162_v0 = vrot.slane %v1154_v61, %v5558_v17  ;;  %v1178_v4 = vrot.slane %v1170_v1, %v5558_v17  ;;  %v5742_v5 = vrot.slane %v1155_v2, %v5558_v17  ;;  %v5745_v49 = vrot.slane %v1171_v3, %v5558_v17 }
 0x43b   :  { %v5786_v61 = vrot.slane %v518_v40, %v5558_v17  ;;  %v5789_v63 = vrot.slane %v519_v41, %v5558_v17 }
 0x43c   :  { %v1186_v55 = vcombine.low %v1162_v0, %v1178_v4  ;;  %v1187_v6 = vcombine.high %v1162_v0, %v1178_v4  ;;  %v1188_v8 = vcombine.low %v5742_v5, %v5745_v49  ;;  %v1189_v9 = vcombine.high %v5742_v5, %v5745_v49 }
 0x43d   :  { %v606_v0 = vcombine.low %v5776_v37, %v5779_v38  ;;  %v534_v5 = vcombine.high %v5776_v37, %v5336_v57  ;;  %v4787_v29 = vcombine.high %v5786_v61, %v5789_v63 }
 0x43e   :  { %5050 = vmatpush3.msra.mxu0 %v1186_v55  ;;  %5055 = vmatpush3.msra.mxu1 %v1187_v6 }
 0x43f   :  { %5059 = vmatprep.subr.mxu0 %v5336_v57  ;;  %5064 = vmatprep.subr.mxu1 %v5336_v57 }
 0x449   :  { %684 = vrot.lane.b32.xlu1 %v5551_v62, %s5337_s26 }
 0x44c   :  { %678 = vrot.lane.b32.xlu0 %v5551_v62, %s5338_s6 }
 0x450   :  { %690 = vrot.lane.b32.xlu0 %v5551_v62, %s5340_s29 }
 0x4bd   :  { %v2248_v13 = vpop.xlane.xlu1 %2247 }
 0x4be   :  { %5274 = vrcp.f32 %v2248_v13 }
 0x4bf   :  { %v2245_v18 = vpop.xlane.xlu0 %2244 }
 0x4c0   :  { %5276 = vrcp.f32 %v2245_v18 }
 0x4c3   :  { %v2251_v28 = vpop.xlane.xlu0 %2250 }
 0x4c5   :  { %v2254_v21 = vpop.xlane.xlu1 %2253 }
 0x4c6   :  { %5278 = vrcp.f32 %v2254_v21 }
 0x4c7   :  { %5280 = vrcp.f32 %v2251_v28  ;;  %v679_v52 = vpop.permute.xlu0 %678  ;;  %v622_v28 = vcombine.low %v5786_v61, %v5789_v63 }
 0x4c8   :  { %v5275_v22 = vpop.eup %5274 }
 0x4c9   :  { %v5764_v27 = vmul.f32 %v5275_v22, %v5711_v23  ;;  %v685_v30 = vpop.permute.xlu1 %684 }
 0x4ca   :  { %v762_v23 = vcombine.low %v5551_v62, %v685_v30  ;;  %v763_v35 = vcombine.high %v5551_v62, %v685_v30  ;;  %v5277_v42 = vpop.eup %5276 }
 0x4cb   :  { %5057 = vmatmul.mubr.msk.f32.vlgmr.msra.gmra.mrb[18].mxu1 %vm1258_vm2, %v5764_v27  ;;  %v2259_v47 = vmul.f32 %v5277_v42, %v5723_v39  ;;  %v691_v50 = vpop.permute.xlu0 %690  ;;  %v4786_v39 = vcombine.high %v5776_v37, %v5779_v38 }
 0x4cc   :  { %5065 = vmatpush3.msra.mxu1 %v1189_v9  ;;  %5066 = vmatprep.mubr.msk.f32.mxu1 %vm5339_vm1, %v5336_v57  ;;  %v770_v48 = vrot.slane %v762_v23, %v5556_v10  ;;  %v777_v54 = vrot.slane %v763_v35, %v5556_v10  ;;  %v778_v62 = vcombine.low %v679_v52, %v691_v50 }
 0x4cd   :  { %5074 = vmatprep.subr.mxu1 %v5336_v57  ;;  %v779_v56 = vcombine.high %v679_v52, %v691_v50  ;;  %5052 = vmatmul.mubr.msk.f32.vlgmr.msra.gmra.mrb[12].mxu0 %vm1258_vm2, %v2259_v47  ;;  %v613_v52 = vrot.slane %v606_v0, %v5556_v10  ;;  %v621_v23 = vrot.slane %v4786_v39, %v5556_v10 }
 0x4ce   :  { %5060 = vmatpush3.msra.mxu0 %v1188_v8  ;;  %5061 = vmatprep.mubr.msk.f32.mxu0 %vm5339_vm1, %v5336_v57  ;;  %v629_v35 = vrot.slane %v622_v28, %v5556_v10 }
 0x4cf   :  { %v793_v2 = vrot.slane %v779_v56, %v5556_v10  ;;  %5069 = vmatprep.subr.mxu0 %v5336_v57 }
 0x4d0   :  { %v5279_v43 = vpop.eup %5278 }
 0x4d1   :  { %v2262_v51 = vmul.f32 %v5279_v43, %v5727_v46  ;;  %v5281_v1 = vpop.eup %5280  ;;  %v786_v46 = vrot.slane %v778_v62, %v5556_v10  ;;  %v810_v9 = vcombine.low %v777_v54, %v793_v2  ;;  %v811_v8 = vcombine.high %v777_v54, %v793_v2 }
 0x4d2   :  { %v2261_v4 = vmul.f32 %v5281_v1, %v5725_v44 }
 0x4d3   :  { %v2279_v3 = vcombine.low %v5764_v27, %v2262_v51  ;;  %5067 = vmatmul.mubr.msk.f32.vlgmr.msra.gmra.mrb[20].mxu1 %vm1258_vm2, %v2262_v51  ;;  %v2280_v49 = vcombine.high %v5764_v27, %v2262_v51  ;;  %v794_v55 = vcombine.low %v770_v48, %v786_v46  ;;  %v795_v6 = vcombine.high %v770_v48, %v786_v46 }
 0x4d4   :  { %5075 = vmatpush3.msra.mxu1 %v5569_v31  ;;  %5062 = vmatmul.mubr.msk.f32.vlgmr.msra.gmra.mrb[14].mxu0 %vm1258_vm2, %v2261_v4  ;;  %v2263_v44 = vcombine.low %v2259_v47, %v2261_v4  ;;  %v2264_v12 = vcombine.high %v2259_v47, %v2261_v4  ;;  %v818_v15 = vrot.slane %v810_v9, %v5558_v17 }
 0x4d5   :  { %5076 = vmatprep.mubr.msk.f32.mxu1 %vm5339_vm1, %v5336_v57  ;;  %v5812_v11 = vrot.slane %v2279_v3, %v5556_v10  ;;  %v802_v13 = vrot.slane %v794_v55, %v5558_v17  ;;  %v809_v14 = vrot.slane %v795_v6, %v5558_v17  ;;  %v825_v16 = vrot.slane %v811_v8, %v5558_v17 }
 0x4d6   :  { %5070 = vmatpush3.msra.mxu0 %v5530_v58  ;;  %5071 = vmatprep.mubr.msk.f32.mxu0 %vm5339_vm1, %v5336_v57  ;;  %v5823_v31 = vrot.slane %v2263_v44, %v5556_v10  ;;  %v5826_v18 = vrot.slane %v2264_v12, %v5556_v10  ;;  %v5829_v20 = vrot.slane %v2280_v49, %v5556_v10 }
 0x4d7   :  { %5079 = vmatprep.subr.mxu0 %v5336_v57  ;;  %v898_v21 = vcombine.low %v802_v13, %v809_v14  ;;  %v4790_v22 = vcombine.high %v802_v13, %v809_v14  ;;  %v914_v24 = vcombine.low %v818_v15, %v825_v16  ;;  %v4791_v25 = vcombine.high %v818_v15, %v825_v16 }
 0x4d8   :  { %5077 = vmatmul.mubr.msk.f32.vlgmr.msra.gmra.mrb[22].mxu1 %vm1258_vm2, %v534_v5  ;;  %5072 = vmatmul.mubr.msk.f32.vlgmr.msra.gmra.mrb[16].mxu0 %vm1258_vm2, %v5776_v37  ;;  %v2296_v58 = vcombine.high %v5823_v31, %v5812_v11  ;;  %v2295_v26 = vcombine.low %v5823_v31, %v5812_v11  ;;  %v2311_v27 = vcombine.low %v5826_v18, %v5829_v20  ;;  %v4506_v31 = vld [vmem:[%s6274_s10] sm:$0xff] }
 0x4d9   :  { %5084 = vmatprep.subr.mxu1 %v5336_v57  ;;  %v905_v30 = vrot.slane %v898_v21, %v5556_v10  ;;  %5080 = vmatpush3.msra.mxu0 %v5535_v59  ;;  %v913_v32 = vrot.slane %v4790_v22, %v5556_v10  ;;  %v921_v33 = vrot.slane %v914_v24, %v5556_v10 }
 0x4da   :  { %v929_v34 = vrot.slane %v4791_v25, %v5556_v10  ;;  %5081 = vmatprep.mubr.msk.f32.mxu0 %vm5339_vm1, %v5336_v57  ;;  %5089 = vmatprep.subr.mxu0 %v5336_v57  ;;  %v535_v59 = vcombine.high %v5779_v38, %v5336_v57  ;;  %v637_v37 = vrot.slane %v4787_v29, %v5556_v10 }
 0x4db   :  { %5085 = vmatpush3.msra.mxu1 %v5596_v45  ;;  %5086 = vmatprep.mubr.msk.f32.mxu1 %vm5339_vm1, %v5336_v57  ;;  %v930_v45 = vcombine.low %v905_v30, %v913_v32  ;;  %v2312_v41 = vcombine.high %v5826_v18, %v5829_v20  ;;  %v931_v42 = vcombine.high %v905_v30, %v913_v32  ;;  %v4845_v20 = vld [vmem:[%s6281_s17] ss:$0 sm:$0xff] }
 0x4dc   :  { %5082 = vmatmul.mubr.msk.f32.vlgmr.msra.gmra.mrb[18].mxu0 %vm1258_vm2, %v5779_v38  ;;  %v946_v40 = vcombine.low %v921_v33, %v929_v34  ;;  %5087 = vmatmul.mubr.msk.f32.vlgmr.msra.gmra.mrb[24].mxu1 %vm1258_vm2, %v535_v59  ;;  %v638_v38 = vcombine.low %v613_v52, %v621_v23  ;;  %v654_v43 = vcombine.low %v629_v35, %v637_v37 }
 0x4dd   :  { %5090 = vmatpush3.msra.mxu0 %v5579_v36  ;;  %5091 = vmatprep.mubr.msk.f32.mxu0 %vm5339_vm1, %v5336_v57  ;;  %v536_v36 = vcombine.high %v5786_v61, %v5336_v57  ;;  %v947_v47 = vcombine.high %v921_v33, %v929_v34  ;;  %v938_v48 = vrot.slane %v930_v45, %v5558_v17 }
 0x4de   :  { %5099 = vmatprep.subr.mxu0 %v5336_v57  ;;  %5094 = vmatprep.subr.mxu1 %v5336_v57  ;;  %v646_v50 = vrot.slane %v638_v38, %v5558_v17  ;;  %v662_v51 = vrot.slane %v654_v43, %v5558_v17  ;;  %v655_v54 = vcombine.high %v629_v35, %v637_v37 }
 0x4df   :  { %5096 = vmatprep.mubr.msk.f32.mxu1 %vm5339_vm1, %v5336_v57  ;;  %5095 = vmatpush3.msra.mxu1 %v5627_v7  ;;  %v954_v7 = vrot.slane %v946_v40, %v5558_v17  ;;  %v945_v56 = vrot.slane %v931_v42, %v5558_v17 }
 0x4e0   :  { %5092 = vmatmul.mubr.msk.f32.vlgmr.msra.gmra.mrb[20].mxu0 %vm1258_vm2, %v5786_v61  ;;  %5104 = vmatprep.subr.mxu1 %v5336_v57  ;;  %v961_v61 = vrot.slane %v947_v47, %v5558_v17  ;;  %v670_v0 = vcombine.low %v646_v50, %v662_v51  ;;  %v669_v1 = vrot.slane %v655_v54, %v5558_v17 }
 0x4e1   :  { %5100 = vmatpush3.msra.mxu0 %v5606_v60  ;;  %5101 = vmatprep.mubr.msk.f32.mxu0 %vm5339_vm1, %v5336_v57  ;;  %v537_v60 = vcombine.high %v5789_v63, %v5336_v57  ;;  %v962_v62 = vcombine.low %v938_v48, %v954_v7  ;;  %v671_v2 = vcombine.high %v646_v50, %v662_v51 }
 0x4e2   :  { %5097 = vmatmul.mubr.msk.f32.vlgmr.msra.gmra.mrb[26].mxu1 %vm1258_vm2, %v536_v36  ;;  %5109 = vmatprep.subr.mxu0 %v5336_v57  ;;  %v964_v46 = vcombine.low %v945_v56, %v961_v61  ;;  %v965_v3 = vcombine.high %v945_v56, %v961_v61 }
 0x4e3   :  { %5105 = vmatpush3.msra.mxu1 %v5642_v19  ;;  %5106 = vmatprep.mubr.msk.f32.mxu1 %vm5339_vm1, %v5336_v57  ;;  %v639_v19 = vcombine.high %v613_v52, %v621_v23 }
 0x4e4   :  { %5102 = vmatmul.mubr.msk.f32.vlgmr.msra.gmra.mrb[22].mxu0 %vm1258_vm2, %v5789_v63  ;;  %5114 = vmatprep.subr.mxu1 %v5336_v57  ;;  %v963_v63 = vcombine.high %v938_v48, %v954_v7 }
 0x4e5   :  { %5111 = vmatprep.mubr.msk.f32.mxu0 %vm5339_vm1, %v5336_v57  ;;  %v653_v39 = vrot.slane %v639_v19, %v5558_v17 }
 0x4e6   :  { %5107 = vmatmul.mubr.msk.f32.vlgmr.msra.gmra.mrb[28].mxu1 %vm1258_vm2, %v537_v60 }
 0x4e7   :  { %5116 = vmatprep.mubr.msk.f32.mxu1 %vm5339_vm1, %v5336_v57  ;;  %v672_v4 = vcombine.low %v653_v39, %v669_v1  ;;  %v673_v5 = vcombine.high %v653_v39, %v669_v1 }
 0x4e8   :  { %5110 = vmatpush3.xpose.msk.msra.mxu0 %vm1258_vm2, %v962_v62 }
 0x4e9   :  { %5119 = vmatprep.subr.mxu0 %v5336_v57 }
 0x4ea   :  { %5115 = vmatpush3.xpose.msk.msra.mxu1 %vm1258_vm2, %v963_v63 }
 0x4eb   :  { %5112 = vmatmul.mubr.msk.f32.vlgmr.msra.gmra.mrb[24].mxu0 %vm1258_vm2, %v670_v0  ;;  %5124 = vmatprep.subr.mxu1 %v5336_v57 }
 0x4ec   :  { %5120 = vmatpush3.xpose.msk.msra.mxu0 %vm1258_vm2, %v964_v46  ;;  %5121 = vmatprep.mubr.msk.f32.mxu0 %vm5339_vm1, %v5336_v57 }
 0x4ed   :  { %5117 = vmatmul.mubr.msk.f32.vlgmr.msra.gmra.mrb[30].mxu1 %vm1258_vm2, %v671_v2  ;;  %5129 = vmatprep.subr.mxu0 %v5336_v57 }
 0x4ee   :  { %5125 = vmatpush3.xpose.msk.msra.mxu1 %vm1258_vm2, %v965_v3  ;;  %5126 = vmatprep.mubr.msk.f32.mxu1 %vm5339_vm1, %v5336_v57 }
 0x4ef   :  { %5122 = vmatmul.mubr.msk.f32.vlgmr.msra.gmra.mrb[26].mxu0 %vm1258_vm2, %v672_v4  ;;  %5134 = vmatprep.subr.mxu1 %v5336_v57 }
 0x4f0   :  { %5131 = vmatprep.mubr.msk.f32.mxu0 %vm5339_vm1, %v5336_v57 }
 0x4f1   :  { %5127 = vmatmul.mubr.msk.f32.vlgmr.msra.gmra.mrb[32].mxu1 %vm1258_vm2, %v673_v5 }
 0x4f2   :  { %5136 = vmatprep.mubr.msk.f32.mxu1 %vm5339_vm1, %v5336_v57 }
 0x59e   :  { %v2515_v49 = vpop.f32.mrb[18].mxu1 }
 0x59f   :  { %v5058_v55 = vpop.f32.mrb[19].mxu1 }
 0x5a0   :  { %v2442_v6 = vpop.f32.mrb[12].mxu0 }
 0x5a1   :  { %v5053_v9 = vpop.f32.mrb[13].mxu0 }
 0x5a6   :  { %v2661_v8 = vpop.f32.mrb[20].mxu1 }
 0x5a7   :  { %v4082_v44 = vcombine.low %v2515_v49, %v2661_v8  ;;  %v4083_v12 = vcombine.high %v2515_v49, %v2661_v8  ;;  %v5068_v13 = vpop.f32.mrb[21].mxu1  ;;  %v2588_v14 = vpop.f32.mrb[14].mxu0 }
 0x5a8   :  { %v4066_v15 = vcombine.low %v2442_v6, %v2588_v14  ;;  %v4067_v16 = vcombine.high %v2442_v6, %v2588_v14  ;;  %v5063_v21 = vpop.f32.mrb[15].mxu0 }
 0x5a9   :  { %v4090_v22 = vrot.slane %v4082_v44, %v5556_v10  ;;  %v4097_v24 = vrot.slane %v4083_v12, %v5556_v10 }
 0x5aa   :  { %v4074_v25 = vrot.slane %v4066_v15, %v5556_v10  ;;  %v4081_v28 = vrot.slane %v4067_v16, %v5556_v10 }
 0x5ab   :  { %v2807_v29 = vpop.f32.mrb[22].mxu1  ;;  %v2734_v30 = vpop.f32.mrb[16].mxu0 }
 0x5ac   :  { %v5078_v32 = vpop.f32.mrb[23].mxu1  ;;  %v4098_v33 = vcombine.low %v4074_v25, %v4090_v22  ;;  %v4099_v34 = vcombine.high %v4074_v25, %v4090_v22  ;;  %v4114_v52 = vcombine.low %v4081_v28, %v4097_v24  ;;  %v4115_v23 = vcombine.high %v4081_v28, %v4097_v24  ;;  %v5073_v59 = vpop.f32.mrb[17].mxu0 }
 0x5ae   :  { %v4106_v35 = vrot.slane %v4098_v33, %v5558_v17  ;;  %v4113_v37 = vrot.slane %v4099_v34, %v5558_v17  ;;  %v4122_v45 = vrot.slane %v4114_v52, %v5558_v17  ;;  %v4129_v40 = vrot.slane %v4115_v23, %v5558_v17 }
 0x5af   :  { %v2880_v36 = vpop.f32.mrb[18].mxu0  ;;  %v2953_v60 = vpop.f32.mrb[24].mxu1 }
 0x5b0   :  { %v4202_v38 = vcombine.low %v4106_v35, %v4113_v37  ;;  %v4837_v42 = vcombine.high %v4106_v35, %v4113_v37  ;;  %v4218_v43 = vcombine.low %v4122_v45, %v4129_v40  ;;  %v4838_v47 = vcombine.high %v4122_v45, %v4129_v40  ;;  %v5083_v48 = vpop.f32.mrb[19].mxu0  ;;  %v5088_v51 = vpop.f32.mrb[25].mxu1 }
 0x5b1   :  { %v3249_v7 = vcombine.low %v2734_v30, %v2880_v36  ;;  %v3257_v50 = vcombine.low %v2807_v29, %v2953_v60 }
 0x5b2   :  { %v4209_v19 = vrot.slane %v4202_v38, %v5556_v10  ;;  %v4217_v54 = vrot.slane %v4837_v42, %v5556_v10  ;;  %v4225_v62 = vrot.slane %v4218_v43, %v5556_v10  ;;  %v4233_v61 = vrot.slane %v4838_v47, %v5556_v10 }
 0x5b3   :  { %v3026_v56 = vpop.f32.mrb[20].mxu0  ;;  %v3256_v63 = vrot.slane %v3249_v7, %v5556_v10  ;;  %v3264_v0 = vrot.slane %v3257_v50, %v5556_v10 }
 0x5b4   :  { %v5093_v39 = vpop.f32.mrb[21].mxu0  ;;  %v4234_v1 = vcombine.low %v4209_v19, %v4217_v54  ;;  %v4235_v46 = vcombine.high %v4209_v19, %v4217_v54  ;;  %v4250_v3 = vcombine.low %v4225_v62, %v4233_v61  ;;  %v4251_v4 = vcombine.high %v4225_v62, %v4233_v61 }
 0x5b5   :  { %v3099_v2 = vpop.f32.mrb[26].mxu1  ;;  %v3281_v5 = vcombine.low %v3256_v63, %v3264_v0  ;;  %v3282_v49 = vcombine.high %v3256_v63, %v3264_v0 }
 0x5b6   :  { %v5098_v55 = vpop.f32.mrb[27].mxu1  ;;  %v5941_v6 = vrot.slane %v4234_v1, %v5558_v17  ;;  %v5944_v9 = vrot.slane %v4235_v46, %v5558_v17  ;;  %v5947_v44 = vrot.slane %v4250_v3, %v5558_v17  ;;  %v5950_v12 = vrot.slane %v4251_v4, %v5558_v17 }
 0x5b7   :  { %v3172_v8 = vpop.f32.mrb[22].mxu0  ;;  %v3289_v23 = vrot.slane %v3281_v5, %v5558_v17  ;;  %v3296_v37 = vrot.slane %v3282_v49, %v5558_v17 }
 0x5b8   :  { %v3265_v13 = vcombine.low %v3026_v56, %v3172_v8  ;;  %v5103_v14 = vpop.f32.mrb[23].mxu0  ;;  %v4267_v16 = vcombine.high %v5941_v6, %v5947_v44  ;;  %v4268_v21 = vcombine.low %v5944_v9, %v5950_v12  ;;  %v4269_v22 = vcombine.high %v5944_v9, %v5950_v12 }
 0x5b9   :  { %v3245_v15 = vpop.f32.mrb[28].mxu1  ;;  %v4266_v24 = vcombine.low %v5941_v6, %v5947_v44 }
 0x5ba   :  { %v3273_v25 = vcombine.low %v3099_v2, %v3245_v15  ;;  %v5108_v28 = vpop.f32.mrb[29].mxu1  ;;  %v3272_v29 = vrot.slane %v3265_v13, %v5556_v10 }
 0x5bc   :  { %v3280_v30 = vrot.slane %v3273_v25, %v5556_v10 }
 0x5be   :  { %v3297_v32 = vcombine.low %v3272_v29, %v3280_v30  ;;  %v3298_v33 = vcombine.high %v3272_v29, %v3280_v30  ;;  %v3389_v34 = vpop.f32.mrb[24].mxu0 }
 0x5bf   :  { %v5113_v52 = vpop.f32.mrb[25].mxu0 }
 0x5c0   :  { %v3305_v59 = vrot.slane %v3297_v32, %v5558_v17  ;;  %v3465_v35 = vpop.f32.mrb[30].mxu1  ;;  %v3312_v45 = vrot.slane %v3298_v33, %v5558_v17 }
 0x5c1   :  { %v5118_v40 = vpop.f32.mrb[31].mxu1 }
 0x5c2   :  { %v3313_v36 = vcombine.low %v3289_v23, %v3305_v59  ;;  %v3314_v38 = vcombine.high %v3289_v23, %v3305_v59  ;;  %v3315_v42 = vcombine.low %v3296_v37, %v3312_v45  ;;  %v3541_v43 = vpop.f32.mrb[26].mxu0  ;;  %v3316_v47 = vcombine.high %v3296_v37, %v3312_v45 }
 0x5c3   :  { %v5123_v48 = vpop.f32.mrb[27].mxu0 }
 0x5c4   :  { %v3390_v7 = vadd.f32 %v3389_v34, %v3313_v36  ;;  %v3466_v60 = vadd.f32 %v3465_v35, %v3314_v38  ;;  %v3542_v50 = vadd.f32 %v3541_v43, %v3315_v42  ;;  %v3617_v51 = vpop.f32.mrb[32].mxu1 }
 0x5c5   :  { %v3618_v19 = vadd.f32 %v3617_v51, %v3316_v47  ;;  %v5128_v54 = vpop.f32.mrb[33].mxu1 }
 0x5c6   :  { %v3621_v62 = vmul.f32 0.35355338, %v3390_v7  ;;  %v3622_v56 = vmul.f32 0.35355338, %v3466_v60  ;;  %v3623_v61 = vmul.f32 0.35355338, %v3542_v50 }
 0x5c7   :  { %v3624_v39 = vmul.f32 0.35355338, %v3618_v19 }
 0x5c8   :  { %v3628_v63 = vsel %vm1258_vm2, %v3622_v56, -inf  ;;  %v3625_v0 = vsel %vm1258_vm2, %v3621_v62, -inf  ;;  %v3631_v1 = vsel %vm1258_vm2, %v3623_v61, -inf }
 0x5c9   :  { %3629 = vmax.xlane.f32.xlu0 %v3628_v63  ;;  %3626 = vmax.xlane.f32.xlu1 %v3625_v0  ;;  %v3634_v46 = vsel %vm1258_vm2, %v3624_v39, -inf }
 0x5cd   :  { %3632 = vmax.xlane.f32.xlu0 %v3631_v1 }
 0x5d1   :  { %3635 = vmax.xlane.f32.xlu0 %v3634_v46 }
 0x5da   :  { %970 = vrot.lane.b32.xlu1 %v5521_v53, %s5338_s6 }
 0x656   :  { %v3630_v2 = vpop.xlane.xlu0 %3629  ;;  %v3627_v3 = vpop.xlane.xlu1 %3626 }
 0x657   :  { %v3638_v4 = vsub.f32 %v3622_v56, %v3630_v2  ;;  %v3637_v5 = vsub.f32 %v3621_v62, %v3627_v3 }
 0x659   :  { %v3643_v49 = vmul.f32 1.442695, %v3638_v4  ;;  %v3641_v55 = vmul.f32 1.442695, %v3637_v5 }
 0x65a   :  { %v3633_v8 = vpop.xlane.xlu0 %3632  ;;  %v971_v35 = vpop.permute.xlu1 %970 }
 0x65b   :  { %5282 = vpow2.f32 %v3643_v49  ;;  %v3639_v13 = vsub.f32 %v3623_v61, %v3633_v8 }
 0x65c   :  { %5284 = vpow2.f32 %v3641_v55 }
 0x65d   :  { %v3645_v14 = vmul.f32 1.442695, %v3639_v13 }
 0x65e   :  { %v3636_v15 = vpop.xlane.xlu0 %3635 }
 0x65f   :  { %5286 = vpow2.f32 %v3645_v14  ;;  %v3640_v25 = vsub.f32 %v3624_v39, %v3636_v15 }
 0x661   :  { %v3647_v28 = vmul.f32 1.442695, %v3640_v25 }
 0x663   :  { %5288 = vpow2.f32 %v3647_v28 }
 0x665   :  { %v5283_v29 = vpop.eup %5282 }
 0x666   :  { %v5285_v30 = vpop.eup %5284  ;;  %v3652_v32 = vsel %vm1258_vm2, %v5283_v29, 0.0 }
 0x667   :  { %v3649_v33 = vsel %vm1258_vm2, %v5285_v30, 0.0  ;;  %3653 = vadd.xlane.f32.xlu0 %v3652_v32 }
 0x668   :  { %3650 = vadd.xlane.f32.xlu1 %v3649_v33 }
 0x669   :  { %v5287_v34 = vpop.eup %5286 }
 0x66a   :  { %v3655_v52 = vsel %vm1258_vm2, %v5287_v34, 0.0 }
 0x66c   :  { %3656 = vadd.xlane.f32.xlu1 %v3655_v52 }
 0x66d   :  { %v5289_v23 = vpop.eup %5288 }
 0x66e   :  { %v3658_v59 = vsel %vm1258_vm2, %v5289_v23, 0.0 }
 0x66f   :  { %3659 = vadd.xlane.f32.xlu0 %v3658_v59 }
 0x67d   :  { %982 = vrot.lane.b32.xlu1 %v5521_v53, %s5340_s29 }
 0x681   :  { %4340 = vrot.lane.b32.xlu1 %v4267_v16, %s5343_s7 }
 0x685   :  { %976 = vrot.lane.b32.xlu0 %v5521_v53, %s5337_s26 }
 0x689   :  { %4348 = vrot.lane.b32.xlu0 %v4268_v21, %s5344_s23 }
 0x68d   :  { %4356 = vrot.lane.b32.xlu0 %v4269_v22, %s5345_s3 }
 0x6f4   :  { %v3654_v45 = vpop.xlane.xlu0 %3653 }
 0x6f5   :  { %v3651_v37 = vpop.xlane.xlu1 %3650 }
 0x6f6   :  { %5290 = vrcp.f32 %v3651_v37 }
 0x6f9   :  { %v3657_v16 = vpop.xlane.xlu1 %3656 }
 0x6fa   :  { %5292 = vrcp.f32 %v3657_v16 }
 0x6fb   :  { %5294 = vrcp.f32 %v3654_v45 }
 0x6fc   :  { %v3660_v40 = vpop.xlane.xlu0 %3659 }
 0x6fd   :  { %v983_v36 = vpop.permute.xlu1 %982  ;;  %5296 = vrcp.f32 %v3660_v40 }
 0x6fe   :  { %v1070_v38 = vcombine.low %v971_v35, %v983_v36  ;;  %v1071_v42 = vcombine.high %v971_v35, %v983_v36 }
 0x700   :  { %v977_v43 = vpop.permute.xlu0 %976  ;;  %v5291_v21 = vpop.eup %5290  ;;  %v1078_v9 = vrot.slane %v1070_v38, %v5556_v10  ;;  %v1085_v12 = vrot.slane %v1071_v42, %v5556_v10 }
 0x701   :  { %v1054_v47 = vcombine.low %v5521_v53, %v977_v43  ;;  %v1055_v48 = vcombine.high %v5521_v53, %v977_v43  ;;  %v3665_v50 = vmul.f32 %v5291_v21, %v5285_v30 }
 0x703   :  { %v1062_v22 = vrot.slane %v1054_v47, %v5556_v10  ;;  %v1069_v7 = vrot.slane %v1055_v48, %v5556_v10 }
 0x704   :  { %v5293_v60 = vpop.eup %5292  ;;  %v4349_v38 = vpop.permute.xlu0 %4348 }
 0x705   :  { %v5295_v51 = vpop.eup %5294  ;;  %v5998_v19 = vmul.f32 %v5293_v60, %v5287_v34  ;;  %v1086_v54 = vcombine.low %v1062_v22, %v1078_v9  ;;  %v1087_v62 = vcombine.high %v1062_v22, %v1078_v9  ;;  %v1102_v56 = vcombine.low %v1069_v7, %v1085_v12  ;;  %v4341_v9 = vpop.permute.xlu1 %4340 }
 0x706   :  { %v1103_v61 = vcombine.high %v1069_v7, %v1085_v12  ;;  %v3666_v46 = vmul.f32 %v5295_v51, %v5283_v29  ;;  %v4362_v60 = vsel %vm1258_vm2, %v4266_v24, %v4341_v9 }
 0x707   :  { %v5297_v63 = vpop.eup %5296  ;;  %v1094_v53 = vrot.slane %v1086_v54, %v5558_v17  ;;  %v1101_v0 = vrot.slane %v1087_v62, %v5558_v17  ;;  %v1110_v39 = vrot.slane %v1102_v56, %v5558_v17  ;;  %v3669_v1 = vcombine.low %v3665_v50, %v5998_v19 }
 0x708   :  { %v3668_v2 = vmul.f32 %v5297_v63, %v5289_v23  ;;  %v1117_v3 = vrot.slane %v1103_v61, %v5558_v17  ;;  %v3670_v4 = vcombine.high %v3665_v50, %v5998_v19  ;;  %v4357_v7 = vpop.permute.xlu0 %4356  ;;  %v4364_v51 = vsel %vm2360_vm3, %v4362_v60, %v4349_v38  ;;  %v4371_v38 = vld [vmem:[%s6272_s8 + $0x18] sm:$0xff] }
 0x709   :  { %v1190_v5 = vcombine.low %v1094_v53, %v1101_v0  ;;  %v4794_v49 = vcombine.high %v1094_v53, %v1101_v0  ;;  %v6011_v29 = vrot.slane %v3669_v1, %v5556_v10 }
 0x70a   :  { %v1206_v55 = vcombine.low %v1110_v39, %v1117_v3  ;;  %v4795_v8 = vcombine.high %v1110_v39, %v1117_v3  ;;  %v3685_v13 = vcombine.low %v3666_v46, %v3668_v2  ;;  %v3686_v25 = vcombine.high %v3666_v46, %v3668_v2 }
 0x70b   :  { %v1197_v14 = vrot.slane %v1190_v5, %v5556_v10  ;;  %v1205_v15 = vrot.slane %v4794_v49, %v5556_v10  ;;  %v6017_v52 = vrot.slane %v3670_v4, %v5556_v10 }
 0x70c   :  { %v1213_v28 = vrot.slane %v1206_v55, %v5556_v10  ;;  %v1221_v30 = vrot.slane %v4795_v8, %v5556_v10  ;;  %v6014_v32 = vrot.slane %v3685_v13, %v5556_v10  ;;  %v6020_v23 = vrot.slane %v3686_v25, %v5556_v10  ;;  %v4368_v8 = vld [vmem:[%s6272_s8] sm:$0xff]  ;;  %v4369_v13 = vld [vmem:[%s6272_s8 + $0x8] sm:$0xff] }
 0x70d   :  { %v1222_v33 = vcombine.low %v1197_v14, %v1205_v15  ;;  %v1223_v34 = vcombine.high %v1197_v14, %v1205_v15 }
 0x70e   :  { %v1238_v59 = vcombine.low %v1213_v28, %v1221_v30  ;;  %v1239_v35 = vcombine.high %v1213_v28, %v1221_v30  ;;  %v3701_v37 = vcombine.low %v6011_v29, %v6014_v32  ;;  %v3702_v45 = vcombine.high %v6011_v29, %v6014_v32 }
 0x70f   :  { %v1230_v16 = vrot.slane %v1222_v33, %v5558_v17  ;;  %v3717_v40 = vcombine.low %v6017_v52, %v6020_v23  ;;  %v3718_v36 = vcombine.high %v6017_v52, %v6020_v23  ;;  %v1237_v43 = vrot.slane %v1223_v34, %v5558_v17 }
 0x710   :  { %v1246_v42 = vrot.slane %v1238_v59, %v5558_v17  ;;  %v1253_v21 = vrot.slane %v1239_v35, %v5558_v17  ;;  %v5214_v30 = vpack.c.bf16 %v4369_v13, %v4368_v8  ;;  %v3709_v13 = vrot.slane %v3701_v37, %v5558_v17 }
 0x711   :  { %v3732_v29 = vrot.slane %v3718_v36, %v5558_v17 }
 0x712   :  { %v1254_v47 = vcombine.low %v1230_v16, %v1246_v42  ;;  %v1255_v48 = vcombine.high %v1230_v16, %v1246_v42  ;;  %v1256_v12 = vcombine.low %v1237_v43, %v1253_v21  ;;  %v1257_v22 = vcombine.high %v1237_v43, %v1253_v21  ;;  %v4370_v16 = vld [vmem:[%s6272_s8 + $0x10] sm:$0xff] }
 0x713   :  { %v3736_v32 = vcombine.high %v3732_v29, %v5336_v57 }
 0x714   :  { %5130 = vmatpush3.msra.mxu0 %v1254_v47  ;;  %5135 = vmatpush3.msra.mxu1 %v1255_v48  ;;  %v5218_v48 = vpack.c.bf16 %v4371_v38, %v4370_v16 }
 0x715   :  { %5132 = vmatmul.mubr.msk.f32.vlgmr.msra.gmra.mrb[28].mxu0 %vm1258_vm2, %v3665_v50  ;;  %5137 = vmatmul.mubr.msk.f32.vlgmr.msra.gmra.mrb[34].mxu1 %vm1258_vm2, %v3666_v46  ;;  %v4366_v50 = vsel %vm2362_vm4, %v4364_v51, %v4357_v7 }
 0x716   :  { %5139 = vmatprep.subr.mxu0 %v5336_v57  ;;  %5144 = vmatprep.subr.mxu1 %v5336_v57 }
 0x717   :  { %5140 = vmatpush3.msra.mxu0 %v1256_v12  ;;  %5145 = vmatpush3.msra.mxu1 %v1257_v22 }
 0x718   :  { %5141 = vmatprep.mubr.msk.f32.mxu0 %vm5339_vm1, %v5336_v57  ;;  %5146 = vmatprep.mubr.msk.f32.mxu1 %vm5339_vm1, %v5336_v57 }
 0x719   :  { %5142 = vmatmul.mubr.msk.f32.vlgmr.msra.gmra.mrb[30].mxu0 %vm1258_vm2, %v5998_v19  ;;  %5147 = vmatmul.mubr.msk.f32.vlgmr.msra.gmra.mrb[36].mxu1 %vm1258_vm2, %v3668_v2 }
 0x71a   :  { %5157 = vmatprep.mubr.msk.f32.mxu0 %vm72_vm0, %v4366_v50  ;;  %5215 = vmatprep.subr.bf16.mxu0 %v5214_v30 }
 0x71b   :  { %5217 = vmatpush3.bf16.msra.mxu0 %v5214_v30 }
 0x71c   :  { %5219 = vmatprep.subr.bf16.mxu0 %v5218_v48 }
 0x71f   :  { %5221 = vmatpush3.bf16.msra.mxu0 %v5218_v48 }
 0x7e8   :  { %v3843_v6 = vpop.f32.mrb[28].mxu0  ;;  %v3916_v44 = vpop.f32.mrb[34].mxu1 }
 0x7e9   :  { %v5133_v24 = vpop.f32.mrb[29].mxu0  ;;  %v5138_v54 = vpop.f32.mrb[35].mxu1 }
 0x7ec   :  { %v3989_v62 = vpop.f32.mrb[30].mxu0  ;;  %v4062_v56 = vpop.f32.mrb[36].mxu1 }
 0x7ed   :  { %v4134_v61 = vcombine.low %v3843_v6, %v3989_v62  ;;  %v4135_v63 = vcombine.high %v3843_v6, %v3989_v62  ;;  %v4150_v53 = vcombine.low %v3916_v44, %v4062_v56  ;;  %v4151_v0 = vcombine.high %v3916_v44, %v4062_v56  ;;  %v5143_v39 = vpop.f32.mrb[31].mxu0  ;;  %v5148_v1 = vpop.f32.mrb[37].mxu1 }
 0x7ee   :  { %v4841_v39 = vld [vmem:[%s6273_s9] ss:$0 sm:$0xff]  ;;  %s5346_s9 = smov 32  }
 0x7ef   :  { %v4142_v46 = vrot.slane %v4134_v61, %v5556_v10  ;;  %v4149_v19 = vrot.slane %v4135_v63, %v5556_v10  ;;  %v4158_v2 = vrot.slane %v4150_v53, %v5556_v10  ;;  %v4165_v3 = vrot.slane %v4151_v0, %v5556_v10 }
 0x7f1   :  { %v4166_v4 = vcombine.low %v4142_v46, %v4158_v2  ;;  %v4167_v5 = vcombine.high %v4142_v46, %v4158_v2  ;;  %v4182_v49 = vcombine.low %v4149_v19, %v4165_v3  ;;  %v4183_v55 = vcombine.high %v4149_v19, %v4165_v3  ;;  %v5310_v3 = vld [vmem:[%s6291_s20 + $0x8] sm:$0xff] }
 0x7f3   :  { %v4174_v14 = vrot.slane %v4166_v4, %v5558_v17  ;;  %v4181_v15 = vrot.slane %v4167_v5, %v5558_v17  ;;  %v4190_v25 = vrot.slane %v4182_v49, %v5558_v17  ;;  %v4197_v28 = vrot.slane %v4183_v55, %v5558_v17  ;;  %v5311_v5 = vld [vmem:[%s6291_s20] sm:$0xff]  ;;  %s5347_s20 = smov 40  }
 0x7f5   :  { %v4270_v33 = vcombine.low %v4174_v14, %v4181_v15  ;;  %v4839_v34 = vcombine.high %v4174_v14, %v4181_v15  ;;  %v4286_v59 = vcombine.low %v4190_v25, %v4197_v28  ;;  %v4840_v35 = vcombine.high %v4190_v25, %v4197_v28 }
 0x7f6   :  { %v3733_v14 = vcombine.high %v3709_v13, %v5336_v57  ;;  %v2310_v15 = vrot.slane %v2296_v58, %v5558_v17  ;;  %v3716_v25 = vrot.slane %v3702_v45, %v5558_v17  ;;  %v3725_v28 = vrot.slane %v3717_v40, %v5558_v17 }
 0x7f7   :  { %v4277_v42 = vrot.slane %v4270_v33, %v5556_v10  ;;  %v4285_v43 = vrot.slane %v4839_v34, %v5556_v10  ;;  %v4293_v21 = vrot.slane %v4286_v59, %v5556_v10  ;;  %v4301_v47 = vrot.slane %v4840_v35, %v5556_v10 }
 0x7f8   :  { %v3734_v37 = vcombine.high %v3716_v25, %v5336_v57  ;;  %v3735_v58 = vcombine.high %v3725_v28, %v5336_v57  ;;  %v2328_v11 = vcombine.high %v2310_v15, %v5336_v57 }
 0x7f9   :  { %v4302_v9 = vcombine.low %v4277_v42, %v4285_v43  ;;  %v4318_v12 = vcombine.low %v4293_v21, %v4301_v47  ;;  %v4303_v22 = vcombine.high %v4277_v42, %v4285_v43  ;;  %v4319_v7 = vcombine.high %v4293_v21, %v4301_v47 }
 0x7fb   :  { %v4310_v60 = vrot.slane %v4302_v9, %v5558_v17  ;;  %v4326_v51 = vrot.slane %v4318_v12, %v5558_v17  ;;  %v4317_v50 = vrot.slane %v4303_v22, %v5558_v17  ;;  %v4333_v6 = vrot.slane %v4319_v7, %v5558_v17 }
 0x7fc   :  { %v2303_v7 = vrot.slane %v2295_v26, %v5558_v17  ;;  %v4507_v26 = vld [vmem:[%s6274_s10 + $0x8] sm:$0xff] }
 0x7fd   :  { %v4335_v44 = vcombine.high %v4310_v60, %v4326_v51  ;;  %v4336_v24 = vcombine.low %v4317_v50, %v4333_v6  ;;  %v4337_v54 = vcombine.high %v4317_v50, %v4333_v6  ;;  %v4334_v10 = vcombine.low %v4310_v60, %v4326_v51 }
 0x7ff   :  { %4342 = vrot.lane.b32.xlu1 %v4335_v44, %s5343_s7 }
 0x803   :  { %4350 = vrot.lane.b32.xlu1 %v4336_v24, %s5344_s23  ;;  %v2327_v24 = vcombine.high %v2303_v7, %v5336_v57 }
 0x807   :  { %4358 = vrot.lane.b32.xlu1 %v4337_v54, %s5345_s3  ;;  %v2319_v54 = vrot.slane %v2311_v27, %v5558_v17  ;;  %v2326_v27 = vrot.slane %v2312_v41, %v5558_v17  ;;  %v4844_v17 = vld [vmem:[%s6280_s16] ss:$0 sm:$0xff] }
 0x871   :  { %v4343_v62 = vpop.permute.xlu1 %4342 }
 0x872   :  { %v4363_v61 = vsel %vm1258_vm2, %v4334_v10, %v4343_v62  ;;  %v5222_v10 = vpack.c.bf16 %v4507_v26, %v4506_v31  ;;  %v4508_v62 = vld [vmem:[%s6274_s10 + $0x10] sm:$0xff] }
 0x874   :  { %5223 = vmatprep.subr.bf16.mxu1 %v5222_v10 }
 0x875   :  { %v4351_v56 = vpop.permute.xlu1 %4350  ;;  %5225 = vmatpush3.bf16.msra.mxu1 %v5222_v10 }
 0x876   :  { %v4365_v63 = vsel %vm2360_vm3, %v4363_v61, %v4351_v56  ;;  %v4509_v56 = vld [vmem:[%s6274_s10 + $0x18] sm:$0xff] }
 0x877   :  { %v5226_v61 = vpack.c.bf16 %v4509_v56, %v4508_v62 }
 0x879   :  { %v4359_v53 = vpop.permute.xlu1 %4358  ;;  %5227 = vmatprep.subr.bf16.mxu1 %v5226_v61 }
 0x87a   :  { %v4367_v0 = vsel %vm2362_vm4, %v4365_v63, %v4359_v53  ;;  %v2329_v63 = vcombine.high %v2319_v54, %v5336_v57  ;;  %5229 = vmatpush3.bf16.msra.mxu1 %v5226_v61  ;;  %v2330_v53 = vcombine.high %v2326_v27, %v5336_v57 }
 0x87b   :  { %5158 = vmatmul.mubr.msk.f32.vlgmr.msra.gmra.mrb[32].mxu0 %vm72_vm0, %v4367_v0 }
 0x94e   :  { %v5159_v1 = vpop.f32.mrb[32].mxu0 }
 0x94f   :  { %v4457_v46 = vadd.f32 %v5159_v1, %v4841_v39  ;;  %v4451_v19 = vpop.f32.mrb[33].mxu0 }
 0x950   :  { %v4452_v2 = vadd.f32 %v4841_v39, %v4451_v19 }
 0x951   :  { %v6093_v4 = vadd.f32 %v5310_v3, %v4457_v46 }
 0x952   :  { %v6098_v49 = vadd.f32 %v5311_v5, %v4452_v2 }
 0x953   :  { %v4465_v55 = vsel %vm72_vm0, %v6093_v4, 0.0 }
 0x954   :  { %4466 = vadd.xlane.f32.xlu1 %v4465_v55  ;;  %v4462_v8 = vsel %vm72_vm0, %v6098_v49, 0.0 }
 0x955   :  { %4463 = vadd.xlane.f32.xlu0 %v4462_v8 }
 0x965   :  { %3738 = vrot.lane.b32.xlu1 %v3733_v14, %s5343_s7 }
 0x969   :  { %2336 = vrot.lane.b32.xlu1 %v2310_v15, %s5344_s23 }
 0x96d   :  { %3742 = vrot.lane.b32.xlu1 %v3716_v25, %s5344_s23 }
 0x971   :  { %3746 = vrot.lane.b32.xlu1 %v3734_v37, %s5345_s3 }
 0x975   :  { %3750 = vrot.lane.b32.xlu1 %v3725_v28, %s5346_s9 }
 0x979   :  { %3754 = vrot.lane.b32.xlu1 %v3735_v58, %s5347_s20 }
 0x97d   :  { %3758 = vrot.lane.b32.xlu1 %v3732_v29, %s5348_s22 }
 0x981   :  { %3762 = vrot.lane.b32.xlu1 %v3736_v32, %s5349_s2 }
 0x9e1   :  { %v4467_v45 = vpop.xlane.xlu1 %4466 }
 0x9e2   :  { %v4469_v40 = vmul.f32 0.03125, %v4467_v45  ;;  %v4464_v30 = vpop.xlane.xlu0 %4463 }
 0x9e3   :  { %v4468_v33 = vmul.f32 0.03125, %v4464_v30 }
 0x9e4   :  { %v6137_v34 = vsub.f32 %v6093_v4, %v4469_v40 }
 0x9e5   :  { %v6140_v59 = vsub.f32 %v6098_v49, %v4468_v33  ;;  %v3739_v52 = vpop.permute.xlu1 %3738 }
 0x9e6   :  { %v4473_v16 = vmul.f32 %v6137_v34, %v6137_v34  ;;  %v3765_v48 = vsel %vm1258_vm2, %v3709_v13, %v3739_v52  ;;  %v4653_v52 = vld [vmem:[%s6276_s12 + $0x8] sm:$0xff] }
 0x9e7   :  { %v4472_v23 = vmul.f32 %v6140_v59, %v6140_v59 }
 0x9e8   :  { %v4477_v42 = vsel %vm72_vm0, %v4473_v16, 0.0 }
 0x9e9   :  { %v6144_v36 = vpop.permute.xlu1 %2336  ;;  %v4474_v35 = vsel %vm72_vm0, %v4472_v23, 0.0 }
 0x9ea   :  { %4475 = vadd.xlane.f32.xlu0 %v4474_v35  ;;  %v4655_v35 = vld [vmem:[%s6276_s12 + $0x18] sm:$0xff] }
 0x9ed   :  { %v3743_v38 = vpop.permute.xlu1 %3742 }
 0x9ee   :  { %4478 = vadd.xlane.f32.xlu0 %v4477_v42  ;;  %v3766_v9 = vsel %vm2360_vm3, %v3765_v48, %v3743_v38  ;;  %v4656_v38 = vld [vmem:[%s6276_s12 + $0x20] sm:$0xff]  ;;  %v4657_v42 = vld [vmem:[%s6276_s12 + $0x28] sm:$0xff] }
 0x9f1   :  { %v3747_v43 = vpop.permute.xlu1 %3746 }
 0x9f2   :  { %v3767_v22 = vsel %vm2362_vm4, %v3766_v9, %v3747_v43  ;;  %v5238_v43 = vpack.c.bf16 %v4657_v42, %v4656_v38  ;;  %v4846_v9 = vld [vmem:[%s6275_s11] ss:$0 sm:$0xff] }
 0x9f5   :  { %v3751_v21 = vpop.permute.xlu1 %3750 }
 0x9f6   :  { %v3768_v60 = vsel %vm72_vm0, %v3767_v22, %v3751_v21  ;;  %v4658_v21 = vld [vmem:[%s6276_s12 + $0x30] sm:$0xff] }
 0x9f9   :  { %v3755_v47 = vpop.permute.xlu1 %3754 }
 0x9fa   :  { %v3769_v51 = vsel %vm2365_vm5, %v3768_v60, %v3755_v47  ;;  %v4659_v47 = vld [vmem:[%s6276_s12 + $0x38] sm:$0xff] }
 0x9fb   :  { %v5242_v48 = vpack.c.bf16 %v4659_v47, %v4658_v21 }
 0x9fd   :  { %v3759_v12 = vpop.permute.xlu1 %3758 }
 0x9fe   :  { %v3770_v50 = vsel %vm2367_vm6, %v3769_v51, %v3759_v12 }
 0xa01   :  { %v3763_v6 = vpop.permute.xlu1 %3762 }
 0xa02   :  { %v3771_v44 = vsel %vm2369_vm7, %v3770_v50, %v3763_v6 }
 0xa03   :  { %4832 = vst.msk [vmem:[%s6283_s19 + $0x4] sm:$0xf] %vm2371_vm8, %v3771_v44 }
 0xa04   :  { %2332 = vrot.lane.b32.xlu0 %v2327_v24, %s5343_s7 }
 0xa08   :  { %2340 = vrot.lane.b32.xlu0 %v2328_v11, %s5345_s3  ;;  %s5350_s3 = smov [#allocation2]  }
 0xa09   :  { %s4758_s5 = sshll.u32 %s5350_s3, 4  ;;  %s4759_s5 = int_to_ptr.vmem [resolvable:$true] %s4758_s5 }
 0xa0a   :  { %s5312_s10 = scalar_lea.vmem %s4759_s5, 256  ;;  %p5317_p1 = scmp.lt.s32.totalorder %s4759_s5, %s4759_s5 }
 0xa0b   :  { %p5313_p0 = scmp.ne.s32.totalorder %s4759_s5, %s5312_s10  ;;  %p5318_p2 = scmp.lt.s32.totalorder %s5312_s10, %s5312_s10 }
 0xa0c   :  { %2344 = vrot.lane.b32.xlu0 %v2319_v54, %s5346_s9 }
 0xa0d   :  { %p5319_p3 = por %p5318_p2, %p5317_p1 }
 0xa0f   :  { %p5320_p4 = pnand %p5319_p3, %p5313_p0 }
 0xa10   :  { %2348 = vrot.lane.b32.xlu0 %v2329_v63, %s5347_s20 }
 0xa14   :  { %2352 = vrot.lane.b32.xlu0 %v2326_v27, %s5348_s22 }
 0xa18   :  { %2356 = vrot.lane.b32.xlu0 %v2330_v53, %s5349_s2 }
 0xa77   :  { %v4476_v0 = vpop.xlane.xlu0 %4475 }
 0xa78   :  { %v4480_v39 = vmul.f32 0.03125, %v4476_v0 }
 0xa7a   :  { %v4482_v1 = vadd.f32 1e-12, %v4480_v39 }
 0xa7b   :  { %v4479_v46 = vpop.xlane.xlu0 %4478 }
 0xa7c   :  { %5298 = vrsqrt.f32 %v4482_v1  ;;  %v4481_v19 = vmul.f32 0.03125, %v4479_v46 }
 0xa7e   :  { %v4483_v2 = vadd.f32 1e-12, %v4481_v19 }
 0xa7f   :  { %v2333_v3 = vpop.permute.xlu0 %2332 }
 0xa80   :  { %5300 = vrsqrt.f32 %v4483_v2  ;;  %v2359_v25 = vsel %vm1258_vm2, %v2303_v7, %v2333_v3 }
 0xa81   :  { %v2361_v28 = vsel %vm2360_vm3, %v2359_v25, %v6144_v36  ;;  %v4654_v36 = vld [vmem:[%s6276_s12 + $0x10] sm:$0xff] }
 0xa82   :  { %v5234_v16 = vpack.c.bf16 %v4655_v35, %v4654_v36 }
 0xa83   :  { %v2341_v5 = vpop.permute.xlu0 %2340 }
 0xa84   :  { %v2363_v32 = vsel %vm2362_vm4, %v2361_v28, %v2341_v5 }
 0xa86   :  { %v5299_v55 = vpop.eup %5298 }
 0xa87   :  { %v2345_v18 = vpop.permute.xlu0 %2344  ;;  %v4486_v57 = vmul.f32 %v5299_v55, %v6140_v59  ;;  %v4652_v59 = vld [vmem:[%s6276_s12] sm:$0xff] }
 0xa88   :  { %v2364_v45 = vsel %vm72_vm0, %v2363_v32, %v2345_v18  ;;  %v5230_v23 = vpack.c.bf16 %v4653_v52, %v4652_v59 }
 0xa89   :  { %v4495_v41 = vmul.f32 %v4844_v17, %v4486_v57 }
 0xa8a   :  { %v5301_v8 = vpop.eup %5300  ;;  %5231 = vmatprep.subr.bf16.mxu0 %v5230_v23 }
 0xa8b   :  { %v4487_v13 = vmul.f32 %v5301_v8, %v6137_v34  ;;  %v2349_v14 = vpop.permute.xlu0 %2348  ;;  %v4504_v15 = vadd.f32 %v4845_v20, %v4495_v41  ;;  %5233 = vmatpush3.bf16.msra.mxu0 %v5230_v23 }
 0xa8c   :  { %v2366_v40 = vsel %vm2365_vm5, %v2364_v45, %v2349_v14  ;;  %5235 = vmatprep.subr.bf16.mxu0 %v5234_v16 }
 0xa8d   :  { %v4496_v37 = vmul.f32 %v4844_v17, %v4487_v13  ;;  %5168 = vmatprep.mubr.msk.f32.mxu1 %vm72_vm0, %v4504_v15 }
 0xa8f   :  { %v4505_v58 = vadd.f32 %v4845_v20, %v4496_v37  ;;  %v2353_v29 = vpop.permute.xlu0 %2352  ;;  %5237 = vmatpush3.bf16.msra.mxu0 %v5234_v16  ;;  %v4849_v16 = vld [vmem:[%s6277_s13] ss:$0 sm:$0xff] }
 0xa90   :  { %v2368_v30 = vsel %vm2367_vm6, %v2366_v40, %v2353_v29  ;;  %5239 = vmatprep.subr.bf16.mxu0 %v5238_v43 }
 0xa91   :  { %5169 = vmatmul.mubr.msk.f32.vlgmr.msra.gmra.mrb[38].mxu1 %vm72_vm0, %v4505_v58 }
 0xa93   :  { %v2357_v33 = vpop.permute.xlu0 %2356  ;;  %5241 = vmatpush3.bf16.msra.mxu0 %v5238_v43 }
 0xa94   :  { %v2370_v34 = vsel %vm2369_vm7, %v2368_v30, %v2357_v33  ;;  %5243 = vmatprep.subr.bf16.mxu0 %v5242_v48 }
 0xa95   :  { %2372 = vst.msk [vmem:[%s6283_s19] sm:$0xf] %vm2371_vm8, %v2370_v34 }
 0xa97   :  { %5245 = vmatpush3.bf16.msra.mxu0 %v5242_v48 }
 0xb64   :  { %v5170_v12 = vpop.f32.mrb[38].mxu1 }
 0xb65   :  { %v4595_v22 = vadd.f32 %v5170_v12, %v4846_v9  ;;  %v4589_v7 = vpop.f32.mrb[39].mxu1 }
 0xb66   :  { %v4590_v60 = vadd.f32 %v4846_v9, %v4589_v7 }
 0xb67   :  { %v4601_v51 = vmul.f32 0.70710677, %v4595_v22  ;;  %v4599_v23 = vmul.f32 0.5, %v4595_v22 }
 0xb68   :  { %v4600_v50 = vmul.f32 0.70710677, %v4590_v60  ;;  %v4598_v59 = vmul.f32 0.5, %v4590_v60 }
 0xb69   :  { %v4603_v6 = vand.u32 2147483647, %v4601_v51  ;;  %vm4643_vm9 = vcmp.ge.f32.partialorder %v4601_v51, 0.0 }
 0xb6a   :  { %v4602_v44 = vand.u32 2147483647, %v4600_v50  ;;  %vm4642_vm10 = vcmp.ge.f32.partialorder %v4600_v50, 0.0 }
 0xb6b   :  { %v4605_v24 = vmul.f32 0.3275911, %v4603_v6  ;;  %v4631_v54 = vsub.f32 0.0, %v4603_v6 }
 0xb6c   :  { %v4604_v11 = vmul.f32 0.3275911, %v4602_v44  ;;  %v4630_v10 = vsub.f32 0.0, %v4602_v44 }
 0xb6d   :  { %v4607_v31 = vadd.f32 1.0, %v4605_v24  ;;  %v4633_v56 = vmul.f32 %v4631_v54, %v4603_v6 }
 0xb6e   :  { %v4606_v26 = vadd.f32 1.0, %v4604_v11  ;;  %v4632_v27 = vmul.f32 %v4630_v10, %v4602_v44 }
 0xb6f   :  { %5302 = vrcp.f32 %v4607_v31  ;;  %v4636_v39 = vmul.f32 1.442695, %v4633_v56 }
 0xb70   :  { %5304 = vrcp.f32 %v4606_v26  ;;  %v4634_v19 = vmul.f32 1.442695, %v4632_v27 }
 0xb71   :  { %5306 = vpow2.f32 %v4636_v39 }
 0xb72   :  { %5308 = vpow2.f32 %v4634_v19 }
 0xb79   :  { %v5303_v62 = vpop.eup %5302 }
 0xb7a   :  { %v5305_v61 = vpop.eup %5304  ;;  %v4613_v63 = vmul.f32 1.0614054, %v5303_v62 }
 0xb7b   :  { %v4612_v53 = vmul.f32 1.0614054, %v5305_v61  ;;  %v5307_v15 = vpop.eup %5306 }
 0xb7c   :  { %v4615_v0 = vadd.f32 -1.4531521, %v4613_v63  ;;  %v5309_v37 = vpop.eup %5308 }
 0xb7d   :  { %v4614_v1 = vadd.f32 -1.4531521, %v4612_v53 }
 0xb7e   :  { %v4617_v46 = vmul.f32 %v5303_v62, %v4615_v0 }
 0xb7f   :  { %v4616_v2 = vmul.f32 %v5305_v61, %v4614_v1 }
 0xb80   :  { %v4619_v3 = vadd.f32 1.4214138, %v4617_v46 }
 0xb81   :  { %v4618_v5 = vadd.f32 1.4214138, %v4616_v2 }
 0xb82   :  { %v4621_v55 = vmul.f32 %v5303_v62, %v4619_v3 }
 0xb83   :  { %v4620_v17 = vmul.f32 %v5305_v61, %v4618_v5 }
 0xb84   :  { %v4623_v18 = vadd.f32 -0.28449672, %v4621_v55 }
 0xb85   :  { %v4622_v57 = vadd.f32 -0.28449672, %v4620_v17 }
 0xb86   :  { %v4625_v20 = vmul.f32 %v5303_v62, %v4623_v18 }
 0xb87   :  { %v4624_v41 = vmul.f32 %v5305_v61, %v4622_v57 }
 0xb88   :  { %v4627_v8 = vadd.f32 0.2548296, %v4625_v20 }
 0xb89   :  { %v4626_v13 = vadd.f32 0.2548296, %v4624_v41 }
 0xb8a   :  { %v4629_v14 = vmul.f32 %v5303_v62, %v4627_v8 }
 0xb8b   :  { %v4628_v25 = vmul.f32 %v5305_v61, %v4626_v13 }
 0xb8c   :  { %v4639_v28 = vmul.f32 %v5307_v15, %v4629_v14 }
 0xb8d   :  { %v4638_v58 = vmul.f32 %v5309_v37, %v4628_v25 }
 0xb8e   :  { %v4641_v29 = vsub.f32 1.0, %v4639_v28 }
 0xb8f   :  { %v4640_v32 = vsub.f32 1.0, %v4638_v58 }
 0xb90   :  { %v4645_v45 = vsub.f32 0.0, %v4641_v29 }
 0xb91   :  { %v4644_v40 = vsub.f32 0.0, %v4640_v32 }
 0xb92   :  { %v4647_v30 = vsel %vm4643_vm9, %v4641_v29, %v4645_v45 }
 0xb93   :  { %v4649_v33 = vadd.f32 1.0, %v4647_v30  ;;  %v4646_v34 = vsel %vm4642_vm10, %v4640_v32, %v4644_v40 }
 0xb94   :  { %v4648_v52 = vadd.f32 1.0, %v4646_v34 }
 0xb95   :  { %v4651_v35 = vmul.f32 %v4649_v33, %v4599_v23 }
 0xb96   :  { %v4650_v36 = vmul.f32 %v4648_v52, %v4598_v59 }
 0xb98   :  { %5187 = vmatprep.mubr.msk.f32.mxu0 %vm4667_vm11, %v4650_v36 }
 0xb99   :  { %5188 = vmatmul.mubr.msk.f32.vlgmr.msra.gmra.mrb[34].mxu0 %vm4667_vm11, %v4651_v35 }
 0xc6c   :  { %v5189_v38 = vpop.f32.mrb[34].mxu0 }
 0xc6d   :  { %v4746_v42 = vadd.f32 %v5189_v38, %v4849_v16  ;;  %v4740_v43 = vpop.f32.mrb[35].mxu0 }
 0xc6e   :  { %v4741_v21 = vadd.f32 %v4849_v16, %v4740_v43 }
 0xc6f   :  { %v4750_v47 = vadd.f32 %v4746_v42, %v6093_v4 }
 0xc70   :  { %v4749_v48 = vadd.f32 %v4741_v21, %v6098_v49 }
 0xc71   :  { %4752 = vst.msk [vmem:[#allocation2 + $0x8] sm:$0xff] %vm72_vm0, %v4750_v47 }
 0xc72   :  { %4751 = vst.msk [vmem:[#allocation2] sm:$0xff] %vm72_vm0, %v4749_v48 }
 0xc73   :  { %5323 = shalt.err (!%p5320_p4)
}
 0xc74   :  { %s5324_s30 = scalar_lea.hbm %s6282_s18, 256 }
 0xc75   :  { %p5325_p5 = scmp.ne.s32.totalorder %s6282_s18, %s5324_s30  ;;  %p5328_p6 = scmp.lt.u32.totalorder %s5324_s30, %s6282_s18 }
 0xc77   :  { %p5330_p7 = pnand %p5328_p6, %p5325_p5 }
 0xc79   :  { %5333 = shalt.err (!%p5330_p7)
}
 0xc7a   :  { %s5351_s1 = smov 128  }
 0xc7b   :  { %4764 = dma.vmem_to_hbm [thread:$0]  %s4759_s5, 256, %s6282_s18, [#allocation3], %s5351_s1, %s5351_s1, %s5343_s7  }
 0xc7c   :  { %5334 = dma.done.wait [#allocation3], 256  }
 0xc7d   :  { %5335 = vsyncadd [#allocation3], 4294967040 }
 0xc7e   :  { %4772 = vsyncpa [#allocation3], 1 }

</bundles_post_ra>
